<compile_context>
chip_gen: v7x
topology: tpu7x:2x2x1
jax: 0.10.0
libtpu: 0.0.40
codegen_flags: <defaults>
</compile_context>

<pallas_src>
import functools

import jax
import jax.numpy as jnp
import numpy as np
from jax.experimental import pallas as pl
from jax.experimental.pallas import tpu as pltpu


# ---------------------------------------------------------------------------
# Shared helpers
# ---------------------------------------------------------------------------
def _vmem_limit_bytes():
    """Generation-aware scoped-VMEM limit (v5e/v6e ~100 MiB, v7x ~48 MiB); safe fallback."""
    try:
        cap = int(pltpu.get_tpu_info().vmem_capacity_bytes)
        return max(32 << 20, min(cap - (16 << 20), 100 << 20))
    except Exception:
        return 32 << 20


def _fold_stats(ssum, ssq, count, gamma, beta, eps):
    """Per-channel batch stats -> single (scale, shift) fold of BatchNorm (f32)."""
    mean = ssum / count
    var = jnp.maximum(ssq / count - mean * mean, 0.0)
    sc = gamma * jax.lax.rsqrt(var + eps)
    sh = beta - mean * sc
    return sc, sh


def _stats_and_store(s, c_ref, st_ref, *, row0, col_keep=None):
    """Per-tile sum/sumsq stats + one aligned full-block store.

    `s` is the f32 conv(+bias) result for the computed rows only.  Stats exclude spatial
    pad positions via the NaN-safe `col_keep` where-mask when the layout needs it.  The
    output tile is written with a single unmasked lane-dense store (boundary rows are
    zero-filled in f32 before the bf16 cast).
    """
    if col_keep is not None:
        s = jnp.where(col_keep, s, 0.0)
    st_ref[0] = jnp.concatenate(
        [jnp.sum(s, axis=0, keepdims=True),
         jnp.sum(s * s, axis=0, keepdims=True)], axis=0)
    n_rows, lanes = c_ref.shape[1], c_ref.shape[2]
    tail = n_rows - row0 - s.shape[0]
    full = jnp.concatenate(
        [jnp.zeros((row0, lanes), jnp.float32), s,
         jnp.zeros((tail, lanes), jnp.float32)], axis=0)
    c_ref[0] = full.astype(c_ref.dtype)


def _bn_act_residual_kernel(c_ref, x_ref, sc_ref, sh_ref, alpha_ref, o_ref, *, scale):
    """Pass 3 (shared by both layouts): folded BN + PReLU, * module scale, + residual."""
    alpha = alpha_ref[0, 0]
    y = c_ref[0].astype(jnp.float32) * sc_ref[...] + sh_ref[...]
    y = jnp.where(y > 0, y, alpha * y)
    # Pad rows/cols/channels are cropped in the wrapper -> no masking needed here.
    o_ref[0] = y * scale + x_ref[0].astype(jnp.float32)


# ---------------------------------------------------------------------------
# Layout A: row-packed (small C) -- lanes = Wp*C, block-banded conv weights
# ---------------------------------------------------------------------------
def _rp_conv3x3(src_bf16, m_ref, bias_row):
    """3x3 conv on one padded image: 3 matmuls (one per dy) against banded (Lp,Lp) weights.

    src must be exactly zero at every spatial pad position.  Returns f32 (Hp-2, Lp):
    conv + bias at interior rows 1..Hp-2 (pad-w lanes come out exactly 0 because the
    corresponding weight columns and bias lanes are zero).
    """
    Hp = src_bf16.shape[0]
    H = Hp - 2
    acc = None
    for g in range(3):                                   # dy = g - 1
        p = jnp.dot(src_bf16, m_ref[g], preferred_element_type=jnp.float32)  # (Hp, Lp)
        t = p[g:g + H, :]                                # rows h'+dy for h' in [1, Hp-2]
        acc = t if acc is None else acc + t
    return acc + bias_row


def _rp_conv_stats_kernel(x_ref, m_ref, b_ref, c_ref, st_ref):
    s = _rp_conv3x3(x_ref[0], m_ref, b_ref[...])
    _stats_and_store(s, c_ref, st_ref, row0=1)


def _rp_bn_act_conv_stats_kernel(c1_ref, m_ref, b_ref, sc_ref, sh_ref, alpha_ref,
                                 c2_ref, st_ref):
    Hp = c1_ref.shape[1]
    alpha = alpha_ref[0, 0]
    y = c1_ref[0].astype(jnp.float32) * sc_ref[...] + sh_ref[...]
    y = jnp.where(y > 0, y, alpha * y)
    # Boundary rows must be exactly zero before conv2's dy=+-1 taps read them
    # (pad-w lanes are already zero because sc/sh are masked there).  NaN-safe where.
    rows = jax.lax.broadcasted_iota(jnp.int32, (Hp, 1), 0)
    a1 = jnp.where((rows >= 1) & (rows <= Hp - 2), y, 0.0).astype(jnp.bfloat16)
    s = _rp_conv3x3(a1, m_ref, b_ref[...])
    _stats_and_store(s, c2_ref, st_ref, row0=1)


def _forward_row_packed(x_nchw, params, *, scale, eps):
    w1, b1, w2, b2, gamma, beta, alpha = params
    N, C, H, W = x_nchw.shape
    Hp, Wp = H + 2, W + 2
    Lr = Wp * C
    Lp = ((Lr + 127) // 128) * 128                       # lane-dense (>=128)
    count = float(N * H * W)

    # host-side layout prep: NCHW -> padded NHWC rows with lane = w*C + c
    x_nhwc = jnp.transpose(x_nchw, (0, 2, 3, 1)).astype(jnp.float32)
    xp = jnp.pad(x_nhwc, ((0, 0), (1, 1), (1, 1), (0, 0))).reshape(N, Hp, Lr)
    x_blk = jnp.pad(xp, ((0, 0), (0, 0), (0, Lp - Lr))).astype(jnp.bfloat16)

    lane_w = jnp.arange(Lr) // C
    keep = ((lane_w >= 1) & (lane_w <= Wp - 2)).astype(jnp.float32)

    def lane_vec(v_c):   # (C,) -> (1, Lp), zero at pad-w lanes and pad lanes
        return jnp.pad(jnp.tile(v_c.astype(jnp.float32), Wp) * keep,
                       (0, Lp - Lr)).reshape(1, Lp)

    def banded_w(w):     # torch (Cout, Cin, 3, 3) -> (3, Lp, Lp) bf16, one matrix per dy
        wcol = jnp.arange(Wp)
        colkeep = ((wcol >= 1) & (wcol <= Wp - 2)).astype(jnp.float32)
        mats = []
        for g in range(3):                               # dy = g - 1
            m = jnp.zeros((Lr, Lr), jnp.float32)
            for j in range(3):                           # dx = j - 1
                dx = j - 1
                sel = jnp.eye(Wp, Wp, k=-dx, dtype=jnp.float32) * colkeep[None, :]
                m = m + jnp.kron(sel, jnp.transpose(w[:, :, g, j]).astype(jnp.float32))
            mats.append(jnp.pad(m, ((0, Lp - Lr), (0, Lp - Lr))))
        return jnp.stack(mats).astype(jnp.bfloat16)

    m1, m2 = banded_w(w1), banded_w(w2)
    b1l, b2l = lane_vec(b1), lane_vec(b2)
    alpha2d = jnp.reshape(alpha, (1, 1)).astype(jnp.float32)

    img_spec = pl.BlockSpec((1, Hp, Lp), lambda n: (n, 0, 0))
    w_spec = pl.BlockSpec((3, Lp, Lp), lambda n: (0, 0, 0))
    row_spec = pl.BlockSpec((1, Lp), lambda n: (0, 0))
    stats_spec = pl.BlockSpec((1, 2, Lp), lambda n: (n, 0, 0))
    smem_scalar = pl.BlockSpec(memory_space=pltpu.MemorySpace.SMEM)
    cparams = pltpu.CompilerParams(dimension_semantics=("parallel",),
                                   vmem_limit_bytes=_vmem_limit_bytes())

    g_c, b_c = gamma.astype(jnp.float32), beta.astype(jnp.float32)

    def bn_fold(st):
        lane = st[:, :, :Lr].reshape(N, 2, Wp, C)        # pad-w lanes contribute exact zeros
        ssum = jnp.sum(lane[:, 0], axis=(0, 1))
        ssq = jnp.sum(lane[:, 1], axis=(0, 1))
        sc_c, sh_c = _fold_stats(ssum, ssq, count, g_c, b_c, eps)
        return lane_vec(sc_c), lane_vec(sh_c)

    slab = jax.ShapeDtypeStruct((N, Hp, Lp), jnp.bfloat16)
    stats = jax.ShapeDtypeStruct((N, 2, Lp), jnp.float32)

    c1, st1 = pl.pallas_call(
        _rp_conv_stats_kernel, grid=(N,),
        in_specs=[img_spec, w_spec, row_spec],
        out_specs=(img_spec, stats_spec),
        out_shape=(slab, stats),
        compiler_params=cparams,
    )(x_blk, m1, b1l)
    sc1, sh1 = bn_fold(st1)

    c2, st2 = pl.pallas_call(
        _rp_bn_act_conv_stats_kernel, grid=(N,),
        in_specs=[img_spec, w_spec, row_spec, row_spec, row_spec, smem_scalar],
        out_specs=(img_spec, stats_spec),
        out_shape=(slab, stats),
        compiler_params=cparams,
    )(c1, m2, b2l, sc1, sh1, alpha2d)
    sc2, sh2 = bn_fold(st2)

    out_blk = pl.pallas_call(
        functools.partial(_bn_act_residual_kernel, scale=float(scale)), grid=(N,),
        in_specs=[img_spec, img_spec, row_spec, row_spec, smem_scalar],
        out_specs=img_spec,
        out_shape=jax.ShapeDtypeStruct((N, Hp, Lp), jnp.float32),
        compiler_params=cparams,
    )(c2, x_blk, sc2, sh2, alpha2d)

    out = out_blk[:, 1:Hp - 1, :Lr].reshape(N, H, Wp, C)[:, :, 1:Wp - 1, :]
    return jnp.transpose(out, (0, 3, 1, 2)).astype(x_nchw.dtype)


# ---------------------------------------------------------------------------
# Layout B: channel-lane (C >= 128) -- lanes = Cp, fused 9-tap conv, chunked 3 taps/matmul
# ---------------------------------------------------------------------------
def _col_keep(n_rows, start, Wp):
    wcol = (jax.lax.broadcasted_iota(jnp.int32, (n_rows, 1), 0) + start) % Wp
    return (wcol >= 1) & (wcol <= Wp - 2)


def _cl_conv3x3(src_bf16, wf_ref, bias_row, *, Wp, r0, L, Cp):
    """3x3 conv on the flattened padded layout: three (rows,Cp)x(Cp,3*Cp) matmuls (one per
    dy group of taps), each followed by 3 row-shifted adds.  src must be zero at every pad
    position.  Returns f32 (L, Cp) = conv + bias at block rows [r0, r0+L)."""
    acc = None
    for g in range(3):                                   # dy = g - 1
        p = jnp.dot(src_bf16, wf_ref[:, g * 3 * Cp:(g + 1) * 3 * Cp],
                    preferred_element_type=jnp.float32)  # (rows, 3*Cp)
        for j in range(3):                               # dx = j - 1
            off = r0 + (g - 1) * Wp + (j - 1)            # static; stays inside the block
            tap = p[off:off + L, j * Cp:(j + 1) * Cp]
            acc = tap if acc is None else acc + tap
    return acc + bias_row


def _cl_conv_stats_kernel(x_ref, wf_ref, b_ref, c_ref, st_ref, *, Wp):
    HpWp, Cp = x_ref.shape[1], x_ref.shape[2]
    r0 = Wp + 1
    L = HpWp - 2 * r0
    s = _cl_conv3x3(x_ref[0], wf_ref, b_ref[...], Wp=Wp, r0=r0, L=L, Cp=Cp)
    _stats_and_store(s, c_ref, st_ref, row0=r0, col_keep=_col_keep(L, r0, Wp))


def _cl_bn_act_conv_stats_kernel(c1_ref, wf_ref, b_ref, sc_ref, sh_ref, alpha_ref,
                                 c2_ref, st_ref, *, Wp):
    HpWp, Cp = c1_ref.shape[1], c1_ref.shape[2]
    r0 = Wp + 1
    L = HpWp - 2 * r0
    alpha = alpha_ref[0, 0]
    y = c1_ref[0].astype(jnp.float32) * sc_ref[...] + sh_ref[...]
    y = jnp.where(y > 0, y, alpha * y)
    # Pad rows/cols must be exactly zero before conv2's taps read them (NaN-safe where).
    rows = jax.lax.broadcasted_iota(jnp.int32, (HpWp, 1), 0)
    wcol = rows % Wp
    interior = (rows >= r0) & (rows < r0 + L) & (wcol >= 1) & (wcol <= Wp - 2)
    a1 = jnp.where(interior, y, 0.0).astype(jnp.bfloat16)
    s = _cl_conv3x3(a1, wf_ref, b_ref[...], Wp=Wp, r0=r0, L=L, Cp=Cp)
    _stats_and_store(s, c2_ref, st_ref, row0=r0, col_keep=_col_keep(L, r0, Wp))


def _forward_channel_lanes(x_nchw, params, *, scale, eps):
    w1, b1, w2, b2, gamma, beta, alpha = params
    N, C, H, W = x_nchw.shape
    Hp, Wp = H + 2, W + 2
    HpWp = Hp * Wp
    Cp = ((C + 127) // 128) * 128
    count = float(N * H * W)

    x_nhwc = jnp.transpose(x_nchw, (0, 2, 3, 1)).astype(jnp.float32)
    x_blk = jnp.pad(x_nhwc, ((0, 0), (1, 1), (1, 1), (0, Cp - C))
                    ).reshape(N, HpWp, Cp).astype(jnp.bfloat16)

    def prep_w(w):   # torch (Cout, Cin, 3, 3) -> fused (Cp, 9*Cp) bf16, tap-major columns
        wm = jnp.transpose(w, (2, 3, 1, 0)).reshape(9, C, C).astype(jnp.float32)
        wm = jnp.pad(wm, ((0, 0), (0, Cp - C), (0, Cp - C)))
        return jnp.transpose(wm, (1, 0, 2)).reshape(Cp, 9 * Cp).astype(jnp.bfloat16)

    def prep_vec(v):
        return jnp.pad(v.astype(jnp.float32), (0, Cp - C)).reshape(1, Cp)

    w1f, w2f = prep_w(w1), prep_w(w2)
    b1v, b2v = prep_vec(b1), prep_vec(b2)
    alpha2d = jnp.reshape(alpha, (1, 1)).astype(jnp.float32)

    img_spec = pl.BlockSpec((1, HpWp, Cp), lambda n: (n, 0, 0))
    w_spec = pl.BlockSpec((Cp, 9 * Cp), lambda n: (0, 0))
    row_spec = pl.BlockSpec((1, Cp), lambda n: (0, 0))
    stats_spec = pl.BlockSpec((1, 2, Cp), lambda n: (n, 0, 0))
    smem_scalar = pl.BlockSpec(memory_space=pltpu.MemorySpace.SMEM)
    cparams = pltpu.CompilerParams(dimension_semantics=("parallel",),
                                   vmem_limit_bytes=_vmem_limit_bytes())

    g_c, b_c = gamma.astype(jnp.float32), beta.astype(jnp.float32)

    def bn_fold(st):
        ssum = jnp.sum(st[:, 0, :C], axis=0)
        ssq = jnp.sum(st[:, 1, :C], axis=0)
        sc_c, sh_c = _fold_stats(ssum, ssq, count, g_c, b_c, eps)
        pad = (0, Cp - C)
        return jnp.pad(sc_c, pad).reshape(1, Cp), jnp.pad(sh_c, pad).reshape(1, Cp)

    slab = jax.ShapeDtypeStruct((N, HpWp, Cp), jnp.bfloat16)
    stats = jax.ShapeDtypeStruct((N, 2, Cp), jnp.float32)

    c1, st1 = pl.pallas_call(
        functools.partial(_cl_conv_stats_kernel, Wp=Wp), grid=(N,),
        in_specs=[img_spec, w_spec, row_spec],
        out_specs=(img_spec, stats_spec),
        out_shape=(slab, stats),
        compiler_params=cparams,
    )(x_blk, w1f, b1v)
    sc1, sh1 = bn_fold(st1)

    c2, st2 = pl.pallas_call(
        functools.partial(_cl_bn_act_conv_stats_kernel, Wp=Wp), grid=(N,),
        in_specs=[img_spec, w_spec, row_spec, row_spec, row_spec, smem_scalar],
        out_specs=(img_spec, stats_spec),
        out_shape=(slab, stats),
        compiler_params=cparams,
    )(c1, w2f, b2v, sc1, sh1, alpha2d)
    sc2, sh2 = bn_fold(st2)

    out_blk = pl.pallas_call(
        functools.partial(_bn_act_residual_kernel, scale=float(scale)), grid=(N,),
        in_specs=[img_spec, img_spec, row_spec, row_spec, smem_scalar],
        out_specs=img_spec,
        out_shape=jax.ShapeDtypeStruct((N, HpWp, Cp), jnp.float32),
        compiler_params=cparams,
    )(c2, x_blk, sc2, sh2, alpha2d)

    out = out_blk.reshape(N, Hp, Wp, Cp)[:, 1:H + 1, 1:W + 1, :C]
    return jnp.transpose(out, (0, 3, 1, 2)).astype(x_nchw.dtype)


# ---------------------------------------------------------------------------
# Dispatcher
# ---------------------------------------------------------------------------
def resnet_block_forward(x_nchw, params, *, scale=1.0, eps=1e-5):
    """Pallas TPU forward of ResnetBlock (norm='batch', activation='prelu', pad_model=None)."""
    N, C, H, W = x_nchw.shape
    Wp = W + 2
    # Small channel counts: pack width*channels into the lane dim (no channel zero-padding).
    # Large C (or small C with huge W, where the banded weight would blow up): channel-lane.
    if C < 128 and Wp * C <= 1024:
        return _forward_row_packed(x_nchw, params, scale=scale, eps=eps)
    return _forward_channel_lanes(x_nchw, params, scale=scale, eps=eps)


# ---------------------------------------------------------------------------
# Pure-JAX reference (matches the PyTorch forward with training-mode BN)
# ---------------------------------------------------------------------------
def reference_forward(x, params, *, scale=1.0, eps=1e-5):
    w1, b1, w2, b2, gamma, beta, alpha = params

    def conv(h, w, b):
        y = jax.lax.conv_general_dilated(
            h, w, window_strides=(1, 1), padding=((1, 1), (1, 1)),
            dimension_numbers=('NCHW', 'OIHW', 'NCHW'),
            precision=jax.lax.Precision.HIGHEST)
        return y + b[None, :, None, None]

    def bn(h):
        m = jnp.mean(h, axis=(0, 2, 3), keepdims=True)
        v = jnp.mean((h - m) ** 2, axis=(0, 2, 3), keepdims=True)
        return ((h - m) / jnp.sqrt(v + eps) * gamma[None, :, None, None]
                + beta[None, :, None, None])

    def prelu(h):
        return jnp.where(h > 0, h, alpha * h)

    out = prelu(bn(conv(x, w1, b1)))
    out = prelu(bn(conv(out, w2, b2)))
    return out * scale + x


if __name__ == "__main__":
    def make_params(key, C):
        kw1, kb1, kw2, kb2 = jax.random.split(key, 4)
        w1 = 0.1 * jax.random.normal(kw1, (C, C, 3, 3), jnp.float32)   # conv1.weight
        b1 = 0.1 * jax.random.normal(kb1, (C,), jnp.float32)           # conv1.bias
        w2 = 0.1 * jax.random.normal(kw2, (C, C, 3, 3), jnp.float32)   # conv2.weight
        b2 = 0.1 * jax.random.normal(kb2, (C,), jnp.float32)           # conv2.bias
        gamma = jnp.ones((C,), jnp.float32)                            # BatchNorm2d.weight
        beta = jnp.zeros((C,), jnp.float32)                            # BatchNorm2d.bias
        alpha = jnp.float32(0.5)                                       # PReLU(init=0.5)
        return (w1, b1, w2, b2, gamma, beta, alpha)

    key = jax.random.PRNGKey(0)
    kp1, kp2, kx1, kx2 = jax.random.split(key, 4)
    fwd = jax.jit(functools.partial(resnet_block_forward, scale=1.0))

    # Case 1: nominal small config (C=4) -> row-packed lane layout.
    x1 = jax.random.normal(kx1, (2, 4, 16, 16), jnp.float32)
    p1 = make_params(kp1, 4)
    out1 = jax.block_until_ready(fwd(x1, p1))
    ref1 = jax.block_until_ready(reference_forward(x1, p1, scale=1.0))
    assert out1.shape == x1.shape
    np.testing.assert_allclose(np.asarray(out1), np.asarray(ref1), rtol=2e-2, atol=2e-2)

    # Case 2: channel-dense config (C=128) -> fused 9-tap channel-lane layout.
    x2 = jax.random.normal(kx2, (2, 128, 8, 8), jnp.float32)
    p2 = make_params(kp2, 128)
    out2 = jax.block_until_ready(fwd(x2, p2))
    ref2 = jax.block_until_ready(reference_forward(x2, p2, scale=1.0))
    assert out2.shape == x2.shape
    # bf16 matmul operands / bf16 inter-pass slabs (f32 accumulation) -> looser tolerance.
    np.testing.assert_allclose(np.asarray(out2), np.asarray(ref2), rtol=3e-2, atol=3e-2)

    print("KERNEL_OK")
</pallas_src>

<mosaic_0001>
module attributes {stable_mosaic.version = 11 : i64} {
  func.func @_rp_conv_stats_kernel(%arg0: i32, %arg1: memref<1x18x128xbf16, #tpu.memory_space<vmem>>, %arg2: memref<3x128x128xbf16, #tpu.memory_space<vmem>>, %arg3: memref<1x128xf32, #tpu.memory_space<vmem>>, %arg4: memref<1x18x128xbf16, #tpu.memory_space<vmem>>, %arg5: memref<1x2x128xf32, #tpu.memory_space<vmem>>) attributes {dimension_semantics = [#tpu.dimension_semantics<parallel>], iteration_bounds = array<i64: 2>, scalar_prefetch = 0 : i64, scratch_operands = 0 : i64, tpu.core_type = #tpu.core_type<tc>, window_params = [{transform_indices = @transform_0, window_bounds = array<i64: 1, 18, 128>}, {pipeline_mode = #tpu.pipeline_mode<synchronous>, transform_indices = @transform_1, window_bounds = array<i64: 3, 128, 128>}, {pipeline_mode = #tpu.pipeline_mode<synchronous>, transform_indices = @transform_2, window_bounds = array<i64: 1, 128>}, {transform_indices = @transform_3, window_bounds = array<i64: 1, 18, 128>}, {transform_indices = @transform_4, window_bounds = array<i64: 1, 2, 128>}]} {
    %c0 = arith.constant 0 : index
    %c0_0 = arith.constant 0 : index
    %c0_1 = arith.constant 0 : index
    %0 = vector.load %arg1[%c0, %c0_0, %c0_1] : memref<1x18x128xbf16, #tpu.memory_space<vmem>>, vector<1x18x128xbf16>
    %1 = vector.shape_cast %0 : vector<1x18x128xbf16> to vector<18x128xbf16>
    %c0_2 = arith.constant 0 : index
    %c0_3 = arith.constant 0 : index
    %2 = vector.load %arg3[%c0_2, %c0_3] : memref<1x128xf32, #tpu.memory_space<vmem>>, vector<1x128xf32>
    %c0_4 = arith.constant 0 : index
    %c0_5 = arith.constant 0 : index
    %c0_6 = arith.constant 0 : index
    %3 = vector.load %arg2[%c0_4, %c0_5, %c0_6] : memref<3x128x128xbf16, #tpu.memory_space<vmem>>, vector<1x128x128xbf16>
    %4 = vector.shape_cast %3 : vector<1x128x128xbf16> to vector<128x128xbf16>
    %cst = arith.constant dense<0.000000e+00> : vector<18x128xf32>
    %5 = tpu.matmul %1, %4, %cst {dimension_numbers = #tpu.dot_dimension_numbers<[1], [0], [0], [1], [0, 0, 1, 1], [], []>} : vector<18x128xbf16>, vector<128x128xbf16>, vector<18x128xf32> -> vector<18x128xf32>
    %6 = vector.extract_strided_slice %5 {offsets = [0, 0], sizes = [16, 128], strides = [1, 1]} : vector<18x128xf32> to vector<16x128xf32>
    %c1 = arith.constant 1 : index
    %c0_7 = arith.constant 0 : index
    %c0_8 = arith.constant 0 : index
    %7 = vector.load %arg2[%c1, %c0_7, %c0_8] : memref<3x128x128xbf16, #tpu.memory_space<vmem>>, vector<1x128x128xbf16>
    %8 = vector.shape_cast %7 : vector<1x128x128xbf16> to vector<128x128xbf16>
    %cst_9 = arith.constant dense<0.000000e+00> : vector<18x128xf32>
    %9 = tpu.matmul %1, %8, %cst_9 {dimension_numbers = #tpu.dot_dimension_numbers<[1], [0], [0], [1], [0, 0, 1, 1], [], []>} : vector<18x128xbf16>, vector<128x128xbf16>, vector<18x128xf32> -> vector<18x128xf32>
    %10 = vector.extract_strided_slice %9 {offsets = [1, 0], sizes = [16, 128], strides = [1, 1]} : vector<18x128xf32> to vector<16x128xf32>
    %11 = arith.addf %6, %10 : vector<16x128xf32>
    %c2 = arith.constant 2 : index
    %c0_10 = arith.constant 0 : index
    %c0_11 = arith.constant 0 : index
    %12 = vector.load %arg2[%c2, %c0_10, %c0_11] : memref<3x128x128xbf16, #tpu.memory_space<vmem>>, vector<1x128x128xbf16>
    %13 = vector.shape_cast %12 : vector<1x128x128xbf16> to vector<128x128xbf16>
    %cst_12 = arith.constant dense<0.000000e+00> : vector<18x128xf32>
    %14 = tpu.matmul %1, %13, %cst_12 {dimension_numbers = #tpu.dot_dimension_numbers<[1], [0], [0], [1], [0, 0, 1, 1], [], []>} : vector<18x128xbf16>, vector<128x128xbf16>, vector<18x128xf32> -> vector<18x128xf32>
    %15 = vector.extract_strided_slice %14 {offsets = [2, 0], sizes = [16, 128], strides = [1, 1]} : vector<18x128xf32> to vector<16x128xf32>
    %16 = arith.addf %11, %15 : vector<16x128xf32>
    %17 = vector.broadcast %2 : vector<1x128xf32> to vector<16x128xf32>
    %18 = arith.addf %16, %17 : vector<16x128xf32>
    %cst_13 = arith.constant dense<0.000000e+00> : vector<128xf32>
    %19 = vector.multi_reduction <add>, %18, %cst_13 [0] : vector<16x128xf32> to vector<128xf32>
    %20 = vector.shape_cast %19 : vector<128xf32> to vector<1x128xf32>
    %21 = arith.mulf %18, %18 : vector<16x128xf32>
    %cst_14 = arith.constant dense<0.000000e+00> : vector<128xf32>
    %22 = vector.multi_reduction <add>, %21, %cst_14 [0] : vector<16x128xf32> to vector<128xf32>
    %23 = vector.shape_cast %22 : vector<128xf32> to vector<1x128xf32>
    %24 = tpu.concatenate %20, %23 in 0 : vector<1x128xf32>, vector<1x128xf32> -> vector<2x128xf32>
    %c0_15 = arith.constant 0 : index
    %c0_16 = arith.constant 0 : index
    %c0_17 = arith.constant 0 : index
    %25 = vector.load %arg5[%c0_15, %c0_16, %c0_17] : memref<1x2x128xf32, #tpu.memory_space<vmem>>, vector<1x2x128xf32>
    %26 = vector.shape_cast %25 : vector<1x2x128xf32> to vector<2x128xf32>
    %27 = vector.shape_cast %24 : vector<2x128xf32> to vector<1x2x128xf32>
    tpu.vector_store %arg5[%c0_15, %c0_16, %c0_17], %27 {strides = array<i32>} : memref<1x2x128xf32, #tpu.memory_space<vmem>>, vector<1x2x128xf32>,
    %cst_18 = arith.constant 0.000000e+00 : f32
    %28 = vector.broadcast %cst_18 : f32 to vector<1x128xf32>
    %cst_19 = arith.constant 0.000000e+00 : f32
    %29 = vector.broadcast %cst_19 : f32 to vector<1x128xf32>
    %30 = tpu.concatenate %28, %18, %29 in 0 : vector<1x128xf32>, vector<16x128xf32>, vector<1x128xf32> -> vector<18x128xf32>
    %31 = arith.truncf %30 : vector<18x128xf32> to vector<18x128xbf16>
    %c0_20 = arith.constant 0 : index
    %c0_21 = arith.constant 0 : index
    %c0_22 = arith.constant 0 : index
    %32 = vector.load %arg4[%c0_20, %c0_21, %c0_22] : memref<1x18x128xbf16, #tpu.memory_space<vmem>>, vector<1x18x128xbf16>
    %33 = vector.shape_cast %32 : vector<1x18x128xbf16> to vector<18x128xbf16>
    %34 = vector.shape_cast %31 : vector<18x128xbf16> to vector<1x18x128xbf16>
    tpu.vector_store %arg4[%c0_20, %c0_21, %c0_22], %34 {strides = array<i32>} : memref<1x18x128xbf16, #tpu.memory_space<vmem>>, vector<1x18x128xbf16>,
    return
  }
  func.func @transform_0(%arg0: i32) -> (i32, i32, i32) {
    %c0_i32 = arith.constant 0 : i32
    %c0_i32_0 = arith.constant 0 : i32
    %c0_i32_1 = arith.constant 0 : i32
    return %arg0, %c0_i32, %c0_i32_0 : i32, i32, i32
  }
  func.func @transform_1(%arg0: i32) -> (i32, i32, i32) {
    %c0_i32 = arith.constant 0 : i32
    %c0_i32_0 = arith.constant 0 : i32
    %c0_i32_1 = arith.constant 0 : i32
    %c0_i32_2 = arith.constant 0 : i32
    return %c0_i32, %c0_i32_0, %c0_i32_1 : i32, i32, i32
  }
  func.func @transform_2(%arg0: i32) -> (i32, i32) {
    %c0_i32 = arith.constant 0 : i32
    %c0_i32_0 = arith.constant 0 : i32
    %c0_i32_1 = arith.constant 0 : i32
    return %c0_i32, %c0_i32_0 : i32, i32
  }
  func.func @transform_3(%arg0: i32) -> (i32, i32, i32) {
    %c0_i32 = arith.constant 0 : i32
    %c0_i32_0 = arith.constant 0 : i32
    %c0_i32_1 = arith.constant 0 : i32
    return %arg0, %c0_i32, %c0_i32_0 : i32, i32, i32
  }
  func.func @transform_4(%arg0: i32) -> (i32, i32, i32) {
    %c0_i32 = arith.constant 0 : i32
    %c0_i32_0 = arith.constant 0 : i32
    %c0_i32_1 = arith.constant 0 : i32
    return %arg0, %c0_i32, %c0_i32_0 : i32, i32, i32
  }
}

module attributes {stable_mosaic.version = 11 : i64} {
  func.func @_bn_act_residual_kernel(%arg0: i32, %arg1: memref<1x18x128xbf16, #tpu.memory_space<vmem>>, %arg2: memref<1x18x128xbf16, #tpu.memory_space<vmem>>, %arg3: memref<1x128xf32, #tpu.memory_space<vmem>>, %arg4: memref<1x128xf32, #tpu.memory_space<vmem>>, %arg5: memref<1x1xf32, #tpu.memory_space<smem>>, %arg6: memref<1x18x128xf32, #tpu.memory_space<vmem>>) attributes {dimension_semantics = [#tpu.dimension_semantics<parallel>], iteration_bounds = array<i64: 2>, scalar_prefetch = 0 : i64, scratch_operands = 0 : i64, tpu.core_type = #tpu.core_type<tc>, window_params = [{transform_indices = @transform_0, window_bounds = array<i64: 1, 18, 128>}, {transform_indices = @transform_1, window_bounds = array<i64: 1, 18, 128>}, {pipeline_mode = #tpu.pipeline_mode<synchronous>, transform_indices = @transform_2, window_bounds = array<i64: 1, 128>}, {pipeline_mode = #tpu.pipeline_mode<synchronous>, transform_indices = @transform_3, window_bounds = array<i64: 1, 128>}, {transform_indices = @transform_4, window_bounds = array<i64: 1, 1>}, {transform_indices = @transform_5, window_bounds = array<i64: 1, 18, 128>}]} {
    %c0 = arith.constant 0 : index
    %c0_0 = arith.constant 0 : index
    %0 = memref.load %arg5[%c0, %c0_0] : memref<1x1xf32, #tpu.memory_space<smem>>
    %c0_1 = arith.constant 0 : index
    %c0_2 = arith.constant 0 : index
    %c0_3 = arith.constant 0 : index
    %1 = vector.load %arg1[%c0_1, %c0_2, %c0_3] : memref<1x18x128xbf16, #tpu.memory_space<vmem>>, vector<1x18x128xbf16>
    %2 = vector.shape_cast %1 : vector<1x18x128xbf16> to vector<18x128xbf16>
    %3 = arith.extf %2 : vector<18x128xbf16> to vector<18x128xf32>
    %c0_4 = arith.constant 0 : index
    %c0_5 = arith.constant 0 : index
    %4 = vector.load %arg3[%c0_4, %c0_5] : memref<1x128xf32, #tpu.memory_space<vmem>>, vector<1x128xf32>
    %5 = vector.broadcast %4 : vector<1x128xf32> to vector<18x128xf32>
    %6 = arith.mulf %3, %5 : vector<18x128xf32>
    %c0_6 = arith.constant 0 : index
    %c0_7 = arith.constant 0 : index
    %7 = vector.load %arg4[%c0_6, %c0_7] : memref<1x128xf32, #tpu.memory_space<vmem>>, vector<1x128xf32>
    %8 = vector.broadcast %7 : vector<1x128xf32> to vector<18x128xf32>
    %9 = arith.addf %6, %8 : vector<18x128xf32>
    %cst = arith.constant 0.000000e+00 : f32
    %10 = vector.broadcast %cst : f32 to vector<18x128xf32>
    %11 = arith.cmpf ogt, %9, %10 : vector<18x128xf32>
    %12 = vector.broadcast %0 : f32 to vector<18x128xf32>
    %13 = arith.mulf %12, %9 : vector<18x128xf32>
    %14 = arith.select %11, %9, %13 : vector<18x128xi1>, vector<18x128xf32>
    %cst_8 = arith.constant 1.000000e+00 : f32
    %15 = vector.broadcast %cst_8 : f32 to vector<18x128xf32>
    %16 = arith.mulf %14, %15 : vector<18x128xf32>
    %c0_9 = arith.constant 0 : index
    %c0_10 = arith.constant 0 : index
    %c0_11 = arith.constant 0 : index
    %17 = vector.load %arg2[%c0_9, %c0_10, %c0_11] : memref<1x18x128xbf16, #tpu.memory_space<vmem>>, vector<1x18x128xbf16>
    %18 = vector.shape_cast %17 : vector<1x18x128xbf16> to vector<18x128xbf16>
    %19 = arith.extf %18 : vector<18x128xbf16> to vector<18x128xf32>
    %20 = arith.addf %16, %19 : vector<18x128xf32>
    %c0_12 = arith.constant 0 : index
    %c0_13 = arith.constant 0 : index
    %c0_14 = arith.constant 0 : index
    %21 = vector.load %arg6[%c0_12, %c0_13, %c0_14] : memref<1x18x128xf32, #tpu.memory_space<vmem>>, vector<1x18x128xf32>
    %22 = vector.shape_cast %21 : vector<1x18x128xf32> to vector<18x128xf32>
    %23 = vector.shape_cast %20 : vector<18x128xf32> to vector<1x18x128xf32>
    tpu.vector_store %arg6[%c0_12, %c0_13, %c0_14], %23 {strides = array<i32>} : memref<1x18x128xf32, #tpu.memory_space<vmem>>, vector<1x18x128xf32>,
    return
  }
  func.func @transform_0(%arg0: i32) -> (i32, i32, i32) {
    %c0_i32 = arith.constant 0 : i32
    %c0_i32_0 = arith.constant 0 : i32
    %c0_i32_1 = arith.constant 0 : i32
    return %arg0, %c0_i32, %c0_i32_0 : i32, i32, i32
  }
  func.func @transform_1(%arg0: i32) -> (i32, i32, i32) {
    %c0_i32 = arith.constant 0 : i32
    %c0_i32_0 = arith.constant 0 : i32
    %c0_i32_1 = arith.constant 0 : i32
    return %arg0, %c0_i32, %c0_i32_0 : i32, i32, i32
  }
  func.func @transform_2(%arg0: i32) -> (i32, i32) {
    %c0_i32 = arith.constant 0 : i32
    %c0_i32_0 = arith.constant 0 : i32
    %c0_i32_1 = arith.constant 0 : i32
    return %c0_i32, %c0_i32_0 : i32, i32
  }
  func.func @transform_3(%arg0: i32) -> (i32, i32) {
    %c0_i32 = arith.constant 0 : i32
    %c0_i32_0 = arith.constant 0 : i32
    %c0_i32_1 = arith.constant 0 : i32
    return %c0_i32, %c0_i32_0 : i32, i32
  }
  func.func @transform_4(%arg0: i32) -> (i32, i32) {
    %c0_i32 = arith.constant 0 : i32
    %c0_i32_0 = arith.constant 0 : i32
    %c0_i32_1 = arith.constant 0 : i32
    return %c0_i32, %c0_i32_0 : i32, i32
  }
  func.func @transform_5(%arg0: i32) -> (i32, i32, i32) {
    %c0_i32 = arith.constant 0 : i32
    %c0_i32_0 = arith.constant 0 : i32
    %c0_i32_1 = arith.constant 0 : i32
    return %arg0, %c0_i32, %c0_i32_0 : i32, i32, i32
  }
}

module attributes {stable_mosaic.version = 11 : i64} {
  func.func @_rp_bn_act_conv_stats_kernel(%arg0: i32, %arg1: memref<1x18x128xbf16, #tpu.memory_space<vmem>>, %arg2: memref<3x128x128xbf16, #tpu.memory_space<vmem>>, %arg3: memref<1x128xf32, #tpu.memory_space<vmem>>, %arg4: memref<1x128xf32, #tpu.memory_space<vmem>>, %arg5: memref<1x128xf32, #tpu.memory_space<vmem>>, %arg6: memref<1x1xf32, #tpu.memory_space<smem>>, %arg7: memref<1x18x128xbf16, #tpu.memory_space<vmem>>, %arg8: memref<1x2x128xf32, #tpu.memory_space<vmem>>) attributes {dimension_semantics = [#tpu.dimension_semantics<parallel>], iteration_bounds = array<i64: 2>, scalar_prefetch = 0 : i64, scratch_operands = 0 : i64, tpu.core_type = #tpu.core_type<tc>, window_params = [{transform_indices = @transform_0, window_bounds = array<i64: 1, 18, 128>}, {pipeline_mode = #tpu.pipeline_mode<synchronous>, transform_indices = @transform_1, window_bounds = array<i64: 3, 128, 128>}, {pipeline_mode = #tpu.pipeline_mode<synchronous>, transform_indices = @transform_2, window_bounds = array<i64: 1, 128>}, {pipeline_mode = #tpu.pipeline_mode<synchronous>, transform_indices = @transform_3, window_bounds = array<i64: 1, 128>}, {pipeline_mode = #tpu.pipeline_mode<synchronous>, transform_indices = @transform_4, window_bounds = array<i64: 1, 128>}, {transform_indices = @transform_5, window_bounds = array<i64: 1, 1>}, {transform_indices = @transform_6, window_bounds = array<i64: 1, 18, 128>}, {transform_indices = @transform_7, window_bounds = array<i64: 1, 2, 128>}]} {
    %c0 = arith.constant 0 : index
    %c0_0 = arith.constant 0 : index
    %0 = memref.load %arg6[%c0, %c0_0] : memref<1x1xf32, #tpu.memory_space<smem>>
    %c0_1 = arith.constant 0 : index
    %c0_2 = arith.constant 0 : index
    %c0_3 = arith.constant 0 : index
    %1 = vector.load %arg1[%c0_1, %c0_2, %c0_3] : memref<1x18x128xbf16, #tpu.memory_space<vmem>>, vector<1x18x128xbf16>
    %2 = vector.shape_cast %1 : vector<1x18x128xbf16> to vector<18x128xbf16>
    %3 = arith.extf %2 : vector<18x128xbf16> to vector<18x128xf32>
    %c0_4 = arith.constant 0 : index
    %c0_5 = arith.constant 0 : index
    %4 = vector.load %arg4[%c0_4, %c0_5] : memref<1x128xf32, #tpu.memory_space<vmem>>, vector<1x128xf32>
    %5 = vector.broadcast %4 : vector<1x128xf32> to vector<18x128xf32>
    %6 = arith.mulf %3, %5 : vector<18x128xf32>
    %c0_6 = arith.constant 0 : index
    %c0_7 = arith.constant 0 : index
    %7 = vector.load %arg5[%c0_6, %c0_7] : memref<1x128xf32, #tpu.memory_space<vmem>>, vector<1x128xf32>
    %8 = vector.broadcast %7 : vector<1x128xf32> to vector<18x128xf32>
    %9 = arith.addf %6, %8 : vector<18x128xf32>
    %cst = arith.constant 0.000000e+00 : f32
    %10 = vector.broadcast %cst : f32 to vector<18x128xf32>
    %11 = arith.cmpf ogt, %9, %10 : vector<18x128xf32>
    %12 = vector.broadcast %0 : f32 to vector<18x128xf32>
    %13 = arith.mulf %12, %9 : vector<18x128xf32>
    %14 = arith.select %11, %9, %13 : vector<18x128xi1>, vector<18x128xf32>
    %15 = tpu.iota {dimensions = array<i32: 0>} : vector<18x1xi32>
    %c1_i32 = arith.constant 1 : i32
    %16 = vector.broadcast %c1_i32 : i32 to vector<18x1xi32>
    %17 = arith.cmpi sge, %15, %16 : vector<18x1xi32>
    %c16_i32 = arith.constant 16 : i32
    %18 = vector.broadcast %c16_i32 : i32 to vector<18x1xi32>
    %19 = arith.cmpi sle, %15, %18 : vector<18x1xi32>
    %20 = arith.andi %17, %19 : vector<18x1xi1>
    %cst_8 = arith.constant 0.000000e+00 : f32
    %21 = vector.shape_cast %20 : vector<18x1xi1> to vector<18x1xi1>
    %22 = vector.broadcast %21 : vector<18x1xi1> to vector<18x128xi1>
    %23 = vector.broadcast %cst_8 : f32 to vector<18x128xf32>
    %24 = arith.select %22, %14, %23 : vector<18x128xi1>, vector<18x128xf32>
    %25 = arith.truncf %24 : vector<18x128xf32> to vector<18x128xbf16>
    %c0_9 = arith.constant 0 : index
    %c0_10 = arith.constant 0 : index
    %26 = vector.load %arg3[%c0_9, %c0_10] : memref<1x128xf32, #tpu.memory_space<vmem>>, vector<1x128xf32>
    %c0_11 = arith.constant 0 : index
    %c0_12 = arith.constant 0 : index
    %c0_13 = arith.constant 0 : index
    %27 = vector.load %arg2[%c0_11, %c0_12, %c0_13] : memref<3x128x128xbf16, #tpu.memory_space<vmem>>, vector<1x128x128xbf16>
    %28 = vector.shape_cast %27 : vector<1x128x128xbf16> to vector<128x128xbf16>
    %cst_14 = arith.constant dense<0.000000e+00> : vector<18x128xf32>
    %29 = tpu.matmul %25, %28, %cst_14 {dimension_numbers = #tpu.dot_dimension_numbers<[1], [0], [0], [1], [0, 0, 1, 1], [], []>} : vector<18x128xbf16>, vector<128x128xbf16>, vector<18x128xf32> -> vector<18x128xf32>
    %30 = vector.extract_strided_slice %29 {offsets = [0, 0], sizes = [16, 128], strides = [1, 1]} : vector<18x128xf32> to vector<16x128xf32>
    %c1 = arith.constant 1 : index
    %c0_15 = arith.constant 0 : index
    %c0_16 = arith.constant 0 : index
    %31 = vector.load %arg2[%c1, %c0_15, %c0_16] : memref<3x128x128xbf16, #tpu.memory_space<vmem>>, vector<1x128x128xbf16>
    %32 = vector.shape_cast %31 : vector<1x128x128xbf16> to vector<128x128xbf16>
    %cst_17 = arith.constant dense<0.000000e+00> : vector<18x128xf32>
    %33 = tpu.matmul %25, %32, %cst_17 {dimension_numbers = #tpu.dot_dimension_numbers<[1], [0], [0], [1], [0, 0, 1, 1], [], []>} : vector<18x128xbf16>, vector<128x128xbf16>, vector<18x128xf32> -> vector<18x128xf32>
    %34 = vector.extract_strided_slice %33 {offsets = [1, 0], sizes = [16, 128], strides = [1, 1]} : vector<18x128xf32> to vector<16x128xf32>
    %35 = arith.addf %30, %34 : vector<16x128xf32>
    %c2 = arith.constant 2 : index
    %c0_18 = arith.constant 0 : index
    %c0_19 = arith.constant 0 : index
    %36 = vector.load %arg2[%c2, %c0_18, %c0_19] : memref<3x128x128xbf16, #tpu.memory_space<vmem>>, vector<1x128x128xbf16>
    %37 = vector.shape_cast %36 : vector<1x128x128xbf16> to vector<128x128xbf16>
    %cst_20 = arith.constant dense<0.000000e+00> : vector<18x128xf32>
    %38 = tpu.matmul %25, %37, %cst_20 {dimension_numbers = #tpu.dot_dimension_numbers<[1], [0], [0], [1], [0, 0, 1, 1], [], []>} : vector<18x128xbf16>, vector<128x128xbf16>, vector<18x128xf32> -> vector<18x128xf32>
    %39 = vector.extract_strided_slice %38 {offsets = [2, 0], sizes = [16, 128], strides = [1, 1]} : vector<18x128xf32> to vector<16x128xf32>
    %40 = arith.addf %35, %39 : vector<16x128xf32>
    %41 = vector.broadcast %26 : vector<1x128xf32> to vector<16x128xf32>
    %42 = arith.addf %40, %41 : vector<16x128xf32>
    %cst_21 = arith.constant dense<0.000000e+00> : vector<128xf32>
    %43 = vector.multi_reduction <add>, %42, %cst_21 [0] : vector<16x128xf32> to vector<128xf32>
    %44 = vector.shape_cast %43 : vector<128xf32> to vector<1x128xf32>
    %45 = arith.mulf %42, %42 : vector<16x128xf32>
    %cst_22 = arith.constant dense<0.000000e+00> : vector<128xf32>
    %46 = vector.multi_reduction <add>, %45, %cst_22 [0] : vector<16x128xf32> to vector<128xf32>
    %47 = vector.shape_cast %46 : vector<128xf32> to vector<1x128xf32>
    %48 = tpu.concatenate %44, %47 in 0 : vector<1x128xf32>, vector<1x128xf32> -> vector<2x128xf32>
    %c0_23 = arith.constant 0 : index
    %c0_24 = arith.constant 0 : index
    %c0_25 = arith.constant 0 : index
    %49 = vector.load %arg8[%c0_23, %c0_24, %c0_25] : memref<1x2x128xf32, #tpu.memory_space<vmem>>, vector<1x2x128xf32>
    %50 = vector.shape_cast %49 : vector<1x2x128xf32> to vector<2x128xf32>
    %51 = vector.shape_cast %48 : vector<2x128xf32> to vector<1x2x128xf32>
    tpu.vector_store %arg8[%c0_23, %c0_24, %c0_25], %51 {strides = array<i32>} : memref<1x2x128xf32, #tpu.memory_space<vmem>>, vector<1x2x128xf32>,
    %cst_26 = arith.constant 0.000000e+00 : f32
    %52 = vector.broadcast %cst_26 : f32 to vector<1x128xf32>
    %cst_27 = arith.constant 0.000000e+00 : f32
    %53 = vector.broadcast %cst_27 : f32 to vector<1x128xf32>
    %54 = tpu.concatenate %52, %42, %53 in 0 : vector<1x128xf32>, vector<16x128xf32>, vector<1x128xf32> -> vector<18x128xf32>
    %55 = arith.truncf %54 : vector<18x128xf32> to vector<18x128xbf16>
    %c0_28 = arith.constant 0 : index
    %c0_29 = arith.constant 0 : index
    %c0_30 = arith.constant 0 : index
    %56 = vector.load %arg7[%c0_28, %c0_29, %c0_30] : memref<1x18x128xbf16, #tpu.memory_space<vmem>>, vector<1x18x128xbf16>
    %57 = vector.shape_cast %56 : vector<1x18x128xbf16> to vector<18x128xbf16>
    %58 = vector.shape_cast %55 : vector<18x128xbf16> to vector<1x18x128xbf16>
    tpu.vector_store %arg7[%c0_28, %c0_29, %c0_30], %58 {strides = array<i32>} : memref<1x18x128xbf16, #tpu.memory_space<vmem>>, vector<1x18x128xbf16>,
    return
  }
  func.func @transform_0(%arg0: i32) -> (i32, i32, i32) {
    %c0_i32 = arith.constant 0 : i32
    %c0_i32_0 = arith.constant 0 : i32
    %c0_i32_1 = arith.constant 0 : i32
    return %arg0, %c0_i32, %c0_i32_0 : i32, i32, i32
  }
  func.func @transform_1(%arg0: i32) -> (i32, i32, i32) {
    %c0_i32 = arith.constant 0 : i32
    %c0_i32_0 = arith.constant 0 : i32
    %c0_i32_1 = arith.constant 0 : i32
    %c0_i32_2 = arith.constant 0 : i32
    return %c0_i32, %c0_i32_0, %c0_i32_1 : i32, i32, i32
  }
  func.func @transform_2(%arg0: i32) -> (i32, i32) {
    %c0_i32 = arith.constant 0 : i32
    %c0_i32_0 = arith.constant 0 : i32
    %c0_i32_1 = arith.constant 0 : i32
    return %c0_i32, %c0_i32_0 : i32, i32
  }
  func.func @transform_3(%arg0: i32) -> (i32, i32) {
    %c0_i32 = arith.constant 0 : i32
    %c0_i32_0 = arith.constant 0 : i32
    %c0_i32_1 = arith.constant 0 : i32
    return %c0_i32, %c0_i32_0 : i32, i32
  }
  func.func @transform_4(%arg0: i32) -> (i32, i32) {
    %c0_i32 = arith.constant 0 : i32
    %c0_i32_0 = arith.constant 0 : i32
    %c0_i32_1 = arith.constant 0 : i32
    return %c0_i32, %c0_i32_0 : i32, i32
  }
  func.func @transform_5(%arg0: i32) -> (i32, i32) {
    %c0_i32 = arith.constant 0 : i32
    %c0_i32_0 = arith.constant 0 : i32
    %c0_i32_1 = arith.constant 0 : i32
    return %c0_i32, %c0_i32_0 : i32, i32
  }
  func.func @transform_6(%arg0: i32) -> (i32, i32, i32) {
    %c0_i32 = arith.constant 0 : i32
    %c0_i32_0 = arith.constant 0 : i32
    %c0_i32_1 = arith.constant 0 : i32
    return %arg0, %c0_i32, %c0_i32_0 : i32, i32, i32
  }
  func.func @transform_7(%arg0: i32) -> (i32, i32, i32) {
    %c0_i32 = arith.constant 0 : i32
    %c0_i32_0 = arith.constant 0 : i32
    %c0_i32_1 = arith.constant 0 : i32
    return %arg0, %c0_i32, %c0_i32_0 : i32, i32, i32
  }
}

</mosaic_0001>

<bundles_post_ra>
// kernel: tile.33
= control target key start
LH: loop header
LB: loop body
LE: loop exit
PB: predicated region body
PF: predicated region fallthrough
CT: control target
= control target key end

     0   :  { %s34_s0 = inlined_call_operand.vmem [shape: f32[4], index: 0, kind: input, shape index: {}]   ;;  %s35_s1 = inlined_call_operand.vmem [shape: f32[18,4], index: 1, kind: output, shape index: {}]  }
   0x1   :  { %v4_v0 = vld [vmem:[%s34_s0] ss:$0 sm:$0xff] }
   0x2   :  { %5 = vst [vmem:[%s35_s1] sm:$0xff] %v4_v0  ;;  %10 = vst [vmem:[%s35_s1 + $0x8] sm:$0xff] %v4_v0 }
   0x3   :  { %11 = vst [vmem:[%s35_s1 + $0x10] sm:$0xff] %v4_v0 }

// kernel: tile.34
= control target key start
LH: loop header
LB: loop body
LE: loop exit
PB: predicated region body
PF: predicated region fallthrough
CT: control target
= control target key end

     0   :  { %s147_s10 = smov 68   ;;  %s148_s11 = smov 60   ;;  %vm3_vm0 = vcmask 31744   ;;  %vm9_vm1 = vcmask 589344   ;;  %vm15_vm2 = vcmask 556544   ;;  %vm21_vm3 = vcmask 523744   ;;  %s231_s0 = inlined_call_operand.vmem [shape: f32[18,4], index: 0, kind: input, shape index: {}]   ;;  %s232_s1 = inlined_call_operand.vmem [shape: f32[72], index: 1, kind: output, shape index: {}]  }
   0x1   :  { %v113_v0 = vld [vmem:[%s231_s0 + $0x11] sm:$0x1]   ;;  %v115_v1 = vld [vmem:[%s231_s0 + $0xf] sm:$0x1]   ;;  %v114_v2 = vld [vmem:[%s231_s0 + $0x10] sm:$0x1]  }
   0x2   :  { %7 = vrot.lane.b32.xlu0 %v113_v0, %s147_s10  ;;  %19 = vrot.lane.b32.xlu1 %v115_v1, %s148_s11  ;;  %v116_v3 = vld [vmem:[%s231_s0 + $0xe] sm:$0x1]   ;;  %s149_s16 = smov 64   ;;  %s150_s17 = smov 56   ;;  %v117_v4 = vld [vmem:[%s231_s0 + $0xd] sm:$0x1]  }
   0x3   :  { %v118_v5 = vld [vmem:[%s231_s0 + $0xc] sm:$0x1]   ;;  %v2_v6 = vld [vmem:[%s231_s0] sm:$0x1]   ;;  %s151_s24 = smov 52   ;;  %s152_s25 = smov 48  }
   0x4   :  { %v119_v7 = vld [vmem:[%s231_s0 + $0xb] sm:$0x1]   ;;  %v120_v8 = vld [vmem:[%s231_s0 + $0xa] sm:$0x1]   ;;  %4 = vst.msk [vmem:[#allocation0] sm:$0x1] %vm3_vm0, %v2_v6  }
   0x5   :  { %s153_s30 = smov 44   ;;  %s154_s2 = smov 40   ;;  %v121_v9 = vld [vmem:[%s231_s0 + $0x9] sm:$0x1]   ;;  %v122_v10 = vld [vmem:[%s231_s0 + $0x8] sm:$0x1]  }
   0x6   :  { %13 = vrot.lane.b32.xlu0 %v114_v2, %s149_s16  ;;  %25 = vrot.lane.b32.xlu1 %v116_v3, %s150_s17  ;;  %s155_s7 = smov 36   ;;  %s156_s8 = smov 32   ;;  %v123_v11 = vld [vmem:[%s231_s0 + $0x7] sm:$0x1]   ;;  %v124_v12 = vld [vmem:[%s231_s0 + $0x6] sm:$0x1]  }
   0x7   :  { %s157_s13 = smov 28   ;;  %s158_s14 = smov 24   ;;  %v125_v13 = vld [vmem:[%s231_s0 + $0x5] sm:$0x1]   ;;  %v126_v14 = vld [vmem:[%s231_s0 + $0x4] sm:$0x1]  }
   0x8   :  { %s159_s19 = smov 20   ;;  %s160_s20 = smov 16   ;;  %v127_v15 = vld [vmem:[%s231_s0 + $0x3] sm:$0x1]   ;;  %v128_v16 = vld [vmem:[%s231_s0 + $0x2] sm:$0x1]  }
   0x9   :  { %s162_s26 = smov 8   ;;  %v129_v17 = vld [vmem:[%s231_s0 + $0x1] sm:$0x1]   ;;  %s163_s0 = smov 4   ;;  %vm27_vm4 = vcmask 490944   ;;  %vm33_vm5 = vcmask 458144  }
   0xa   :  { %31 = vrot.lane.b32.xlu0 %v117_v4, %s151_s24  ;;  %37 = vrot.lane.b32.xlu1 %v118_v5, %s152_s25  ;;  %s161_s25 = smov 12   ;;  %vm39_vm6 = vcmask 425344   ;;  %vm45_vm7 = vcmask 392544   ;;  %vm51_vm8 = vcmask 359744   ;;  %vm57_vm9 = vcmask 326944  }
   0xb   :  { %vm63_vm10 = vcmask 294144   ;;  %vm69_vm11 = vcmask 261344   ;;  %vm75_vm12 = vcmask 228544   ;;  %vm81_vm13 = vcmask 195744  }
   0xc   :  { %vm87_vm14 = vcmask 162944   ;;  %vm93_vm15 = vcmask 130144   ;;  %vm99_vm0 = vcmask 97344  }
   0xe   :  { %43 = vrot.lane.b32.xlu0 %v119_v7, %s153_s30  ;;  %49 = vrot.lane.b32.xlu1 %v120_v8, %s154_s2 }
  0x12   :  { %55 = vrot.lane.b32.xlu0 %v121_v9, %s155_s7  ;;  %61 = vrot.lane.b32.xlu1 %v122_v10, %s156_s8 }
  0x16   :  { %67 = vrot.lane.b32.xlu0 %v123_v11, %s157_s13  ;;  %73 = vrot.lane.b32.xlu1 %v124_v12, %s158_s14 }
  0x1a   :  { %79 = vrot.lane.b32.xlu0 %v125_v13, %s159_s19  ;;  %85 = vrot.lane.b32.xlu1 %v126_v14, %s160_s20 }
  0x1e   :  { %91 = vrot.lane.b32.xlu0 %v127_v15, %s161_s25  ;;  %97 = vrot.lane.b32.xlu1 %v128_v16, %s162_s26 }
  0x22   :  { %103 = vrot.lane.b32.xlu0 %v129_v17, %s163_s0 }
  0x74   :  { %v8_v18 = vpop.permute.xlu0 %7   ;;  %v20_v19 = vpop.permute.xlu1 %19  }
  0x75   :  { %10 = vst.msk [vmem:[#allocation0] sm:$0x1] %vm9_vm1, %v8_v18   ;;  %vm105_vm1 = vcmask 64544  }
  0x78   :  { %v14_v20 = vpop.permute.xlu0 %13   ;;  %v26_v21 = vpop.permute.xlu1 %25  }
  0x79   :  { %16 = vst.msk [vmem:[#allocation0] sm:$0x1] %vm15_vm2, %v14_v20  }
  0x7a   :  { %22 = vst.msk [vmem:[#allocation0] sm:$0x1] %vm21_vm3, %v20_v19  }
  0x7b   :  { %28 = vst.msk [vmem:[#allocation0] sm:$0x1] %vm27_vm4, %v26_v21  }
  0x7c   :  { %v32_v22 = vpop.permute.xlu0 %31   ;;  %v38_v23 = vpop.permute.xlu1 %37  }
  0x7d   :  { %34 = vst.msk [vmem:[#allocation0] sm:$0x1] %vm33_vm5, %v32_v22  }
  0x7e   :  { %40 = vst.msk [vmem:[#allocation0] sm:$0x1] %vm39_vm6, %v38_v23  }
  0x80   :  { %v44_v24 = vpop.permute.xlu0 %43   ;;  %v50_v25 = vpop.permute.xlu1 %49  }
  0x81   :  { %46 = vst.msk [vmem:[#allocation0] sm:$0x1] %vm45_vm7, %v44_v24  }
  0x82   :  { %52 = vst.msk [vmem:[#allocation0] sm:$0x1] %vm51_vm8, %v50_v25  }
  0x84   :  { %v56_v26 = vpop.permute.xlu0 %55   ;;  %v62_v27 = vpop.permute.xlu1 %61  }
  0x85   :  { %58 = vst.msk [vmem:[#allocation0] sm:$0x1] %vm57_vm9, %v56_v26  }
  0x86   :  { %64 = vst.msk [vmem:[#allocation0] sm:$0x1] %vm63_vm10, %v62_v27  }
  0x88   :  { %v68_v28 = vpop.permute.xlu0 %67   ;;  %v74_v29 = vpop.permute.xlu1 %73  }
  0x89   :  { %70 = vst.msk [vmem:[#allocation0] sm:$0x1] %vm69_vm11, %v68_v28  }
  0x8a   :  { %76 = vst.msk [vmem:[#allocation0] sm:$0x1] %vm75_vm12, %v74_v29  }
  0x8c   :  { %v80_v30 = vpop.permute.xlu0 %79   ;;  %v86_v31 = vpop.permute.xlu1 %85  }
  0x8d   :  { %82 = vst.msk [vmem:[#allocation0] sm:$0x1] %vm81_vm13, %v80_v30  }
  0x8e   :  { %88 = vst.msk [vmem:[#allocation0] sm:$0x1] %vm87_vm14, %v86_v31  }
  0x90   :  { %v92_v32 = vpop.permute.xlu0 %91   ;;  %v98_v33 = vpop.permute.xlu1 %97  }
  0x91   :  { %94 = vst.msk [vmem:[#allocation0] sm:$0x1] %vm93_vm15, %v92_v32  }
  0x92   :  { %100 = vst.msk [vmem:[#allocation0] sm:$0x1] %vm99_vm0, %v98_v33  }
  0x94   :  { %v104_v34 = vpop.permute.xlu0 %103  }
  0x95   :  { %106 = vst.msk [vmem:[#allocation0] sm:$0x1] %vm105_vm1, %v104_v34  }
  0x9c   :  { %v110_v35 = vld [vmem:[#allocation0] sm:$0x1] }
  0x9d   :  { %112 = vst [vmem:[%s232_s1] sm:$0x1] %v110_v35 }

// kernel: resnet_block_forward.3
= control target key start
LH: loop header
LB: loop body
LE: loop exit
PB: predicated region body
PF: predicated region fallthrough
CT: control target
= control target key end

     0   :  { %s964_s15 = smov 0   ;;  %s1071_s0 = inlined_call_operand.vmem [shape: bf16[2,18,128], index: 0, kind: input, shape index: {}]   ;;  %s1072_s1 = inlined_call_operand.vmem [shape: bf16[3,128,128], index: 1, kind: input, shape index: {}]   ;;  %s1073_s2 = inlined_call_operand.vmem [shape: f32[1,128], index: 2, kind: input, shape index: {}]   ;;  %s1074_s3 = inlined_call_operand.vmem [shape: bf16[2,18,128], index: 3, kind: output, shape index: {0}]   ;;  %s1075_s4 = inlined_call_operand.vmem [shape: f32[2,2,128], index: 4, kind: output, shape index: {1}]  }
   0x1 LB: > { %s726_s16 = sadd.s32 4294967295, %s937_s15   ;;  %p730_p0 = scmp.ge.s32.totalorder %s937_s15, 1  ;;  %s937_s15 = sphi %s964_s15, %s15_s15  }
   0x2   : > { %p165_p1 = scmp.lt.s32.totalorder %s937_s15, 3 }
   0x4   : > { %p166_p2 = pnand %p730_p0, %p165_p1 }
   0x5   : > { %v905_v0 = vld [vmem:[%s1072_s1] sm:$0xff] (!%p166_p2)   ;;  %p195_p3 = scmp.lt.s32.totalorder (!%p166_p2), %s726_s16, 1  ;;  %v907_v2 = vld [vmem:[%s1072_s1 + $0x8] sm:$0xff] (!%p166_p2)   ;;  %v909_v4 = vld [vmem:[%s1072_s1 + $0x10] sm:$0xff] (!%p166_p2)   ;;  %vm451_vm0 = vcmask (!%p166_p2), 1046528   ;;  %vm577_vm1 = vcmask (!%p166_p2), 1045504  }
   0x6   : > { %169 = sbr.rel (%p166_p2) target bundleno = 310 (0x136), region = 32  ;;  %v906_v1 = vld [vmem:[%s1072_s1 + $0x40] sm:$0xff] (!%p166_p2)   ;;  %836 = vmatprep.subr.bf16.mxu0 (!%p166_p2), %v905_v0  ;;  %v908_v3 = vld [vmem:[%s1072_s1 + $0x48] sm:$0xff] (!%p166_p2)   ;;  %v910_v5 = vld [vmem:[%s1072_s1 + $0x50] sm:$0xff] (!%p166_p2)   ;;  %vm611_vm2 = vcmask (!%p166_p2), 1040384  }
   0x7   : > { %856 = vmatprep.subr.bf16.mxu1 (!%p166_p2), %v906_v1  ;;  %837 = vmatpush3.bf16.msra.mxu0 (!%p166_p2), %v905_v0  ;;  %v911_v6 = vld [vmem:[%s1072_s1 + $0x18] sm:$0xff] (!%p166_p2)   ;;  %v913_v8 = vld [vmem:[%s1072_s1 + $0x20] sm:$0xff] (!%p166_p2)   ;;  %v915_v10 = vld [vmem:[%s1072_s1 + $0x28] sm:$0xff] (!%p166_p2)  }
   0x8   : > { %857 = vmatpush3.bf16.msra.mxu1 (!%p166_p2), %v906_v1  ;;  %838 = vmatprep.subr.bf16.mxu0 (!%p166_p2), %v907_v2  ;;  %v912_v7 = vld [vmem:[%s1072_s1 + $0x58] sm:$0xff] (!%p166_p2)   ;;  %v914_v9 = vld [vmem:[%s1072_s1 + $0x60] sm:$0xff] (!%p166_p2)   ;;  %v916_v12 = vld [vmem:[%s1072_s1 + $0x68] sm:$0xff] (!%p166_p2)  }
   0x9   : > { %858 = vmatprep.subr.bf16.mxu1 (!%p166_p2), %v908_v3  ;;  %v917_v13 = vld [vmem:[%s1072_s1 + $0x30] sm:$0xff] (!%p166_p2)   ;;  %v919_v15 = vld [vmem:[%s1072_s1 + $0x38] sm:$0xff] (!%p166_p2)   ;;  %v923_v17 = vld [vmem:[%s1072_s1 + $0x80] sm:$0xff] (!%p166_p2)  }
   0xa   : > { %v918_v14 = vld [vmem:[%s1072_s1 + $0x70] sm:$0xff] (!%p166_p2)   ;;  %v920_v16 = vld [vmem:[%s1072_s1 + $0x78] sm:$0xff] (!%p166_p2)   ;;  %v924_v19 = vld [vmem:[%s1072_s1 + $0x88] sm:$0xff] (!%p166_p2)  }
   0xb   : > { %839 = vmatpush3.bf16.msra.mxu0 (!%p166_p2), %v907_v2  ;;  %v925_v20 = vld [vmem:[%s1072_s1 + $0x90] sm:$0xff] (!%p166_p2)   ;;  %v926_v21 = vld [vmem:[%s1072_s1 + $0x98] sm:$0xff] (!%p166_p2)   ;;  %v927_v22 = vld [vmem:[%s1072_s1 + $0xa0] sm:$0xff] (!%p166_p2)  }
   0xc   : > { %859 = vmatpush3.bf16.msra.mxu1 (!%p166_p2), %v908_v3  ;;  %840 = vmatprep.subr.bf16.mxu0 (!%p166_p2), %v909_v4  ;;  %v928_v23 = vld [vmem:[%s1072_s1 + $0xa8] sm:$0xff] (!%p166_p2)   ;;  %v929_v24 = vld [vmem:[%s1072_s1 + $0xb0] sm:$0xff] (!%p166_p2)   ;;  %v930_v25 = vld [vmem:[%s1072_s1 + $0xb8] sm:$0xff] (!%p166_p2)  }
   0xd   : > { %s1077_s16 = smov (!%p195_p3, %s726_s16), 1  ;;  %860 = vmatprep.subr.bf16.mxu1 %v910_v5  ;;  %v792_v48 = vld [vmem:[%s1073_s2] ss:$0 sm:$0xff] }
   0xe   : > { %s896_s7 = smul.u32 12, %s1077_s16  ;;  %s733_s27 = sshll.u32 %s1077_s16, 1 }
   0xf   : > { %841 = vmatpush3.bf16.msra.mxu0 %v909_v4  ;;  %s208_s29 = scalar_lea.vmem %s1075_s4, %s733_s27 }
  0x10   : > { %861 = vmatpush3.bf16.msra.mxu1 %v910_v5  ;;  %842 = vmatprep.subr.bf16.mxu0 %v911_v6  ;;  %s199_s14 = scalar_lea.vmem %s1071_s0, %s896_s7  ;;  %s204_s26 = scalar_lea.vmem %s1074_s3, %s896_s7 }
  0x11   : > { %862 = vmatprep.subr.bf16.mxu1 %v912_v7  ;;  %v921_v11 = vld [vmem:[%s199_s14] sm:$0xff]   ;;  %v922_v18 = vld [vmem:[%s199_s14 + $0x8] ss:$0 sps:$4 sm:$0x11]  }
  0x12   : > { %852 = vmatprep.mubr.bf16.mxu0 %v921_v11  ;;  %872 = vmatprep.mubr.bf16.mxu1 %v921_v11 }
  0x13   : > { %843 = vmatpush3.bf16.msra.mxu0 %v911_v6 }
  0x14   : > { %863 = vmatpush3.bf16.msra.mxu1 %v912_v7  ;;  %844 = vmatprep.subr.bf16.mxu0 %v913_v8 }
  0x15   : > { %864 = vmatprep.subr.bf16.mxu1 %v914_v9 }
  0x17   : > { %845 = vmatpush3.bf16.msra.mxu0 %v913_v8 }
  0x18   : > { %865 = vmatpush3.bf16.msra.mxu1 %v914_v9  ;;  %846 = vmatprep.subr.bf16.mxu0 %v915_v10 }
  0x19   : > { %866 = vmatprep.subr.bf16.mxu1 %v916_v12 }
  0x1b   : > { %847 = vmatpush3.bf16.msra.mxu0 %v915_v10 }
  0x1c   : > { %867 = vmatpush3.bf16.msra.mxu1 %v916_v12  ;;  %848 = vmatprep.subr.bf16.mxu0 %v917_v13 }
  0x1d   : > { %868 = vmatprep.subr.bf16.mxu1 %v918_v14 }
  0x1f   : > { %849 = vmatpush3.bf16.msra.mxu0 %v917_v13 }
  0x20   : > { %869 = vmatpush3.bf16.msra.mxu1 %v918_v14  ;;  %850 = vmatprep.subr.bf16.mxu0 %v919_v15 }
  0x21   : > { %870 = vmatprep.subr.bf16.mxu1 %v920_v16 }
  0x23   : > { %851 = vmatpush3.bf16.msra.mxu0 %v919_v15 }
  0x24   : > { %871 = vmatpush3.bf16.msra.mxu1 %v920_v16  ;;  %876 = vmatprep.subr.bf16.mxu0 %v923_v17 }
  0x26   : > { %853 = vmatmul.mubr.bf16.vlgmr.msra.gmra.mrb[0].mxu0 %v922_v18 }
  0x27   : > { %873 = vmatmul.mubr.bf16.vlgmr.msra.gmra.mrb[0].mxu1 %v922_v18  ;;  %877 = vmatpush3.bf16.msra.mxu0 %v923_v17 }
  0x28   : > { %878 = vmatprep.subr.bf16.mxu0 %v924_v19  ;;  %892 = vmatprep.mubr.bf16.mxu0 %v921_v11 }
  0x2b   : > { %879 = vmatpush3.bf16.msra.mxu0 %v924_v19 }
  0x2c   : > { %880 = vmatprep.subr.bf16.mxu0 %v925_v20 }
  0x2f   : > { %881 = vmatpush3.bf16.msra.mxu0 %v925_v20 }
  0x30   : > { %882 = vmatprep.subr.bf16.mxu0 %v926_v21 }
  0x33   : > { %883 = vmatpush3.bf16.msra.mxu0 %v926_v21 }
  0x34   : > { %884 = vmatprep.subr.bf16.mxu0 %v927_v22 }
  0x37   : > { %885 = vmatpush3.bf16.msra.mxu0 %v927_v22 }
  0x38   : > { %886 = vmatprep.subr.bf16.mxu0 %v928_v23 }
  0x3b   : > { %887 = vmatpush3.bf16.msra.mxu0 %v928_v23 }
  0x3c   : > { %888 = vmatprep.subr.bf16.mxu0 %v929_v24 }
  0x3f   : > { %889 = vmatpush3.bf16.msra.mxu0 %v929_v24 }
  0x40   : > { %890 = vmatprep.subr.bf16.mxu0 %v930_v25 }
  0x43   : > { %891 = vmatpush3.bf16.msra.mxu0 %v930_v25 }
  0x46   : > { %893 = vmatmul.mubr.bf16.vlgmr.msra.gmra.mrb[4].mxu0 %v922_v18 }
  0xf9   : > { %v854_v26 = vpop.f32.mrb[0].mxu0 }
  0xfa   : > { %v874_v27 = vpop.f32.mrb[0].mxu1  ;;  %v322_v28 = vpop.f32.mrb[1].mxu0 }
  0xfb   : > { %v434_v29 = vpop.f32.mrb[1].mxu1  ;;  %v855_v30 = vpop.f32.mrb[2].mxu0  ;;  %v455_v31 = vrot.slane %v874_v27, 1 }
  0xfc   : > { %v452_v32 = vrot.slane %v434_v29, 1  ;;  %v875_v33 = vpop.f32.mrb[2].mxu1  ;;  %v325_v34 = vpop.f32.mrb[3].mxu0 }
  0xfd   : > { %v437_v35 = vpop.f32.mrb[3].mxu1 }
  0xfe   : > { %v453_v36 = vrot.slane %v437_v35, 1 }
 0x100   : > { %v454_v37 = vsel %vm451_vm0, %v452_v32, %v453_v36  ;;  %v456_v38 = vsel %vm451_vm0, %v453_v36, %v455_v31 }
 0x101   : > { %v459_v39 = vadd.f32 %v454_v37, %v322_v28  ;;  %v460_v40 = vadd.f32 %v456_v38, %v325_v34 }
 0x119   : > { %v894_v41 = vpop.f32.mrb[4].mxu0 }
 0x11a   : > { %v560_v42 = vpop.f32.mrb[5].mxu0  ;;  %v581_v45 = vrot.slane %v894_v41, 2 }
 0x11b   : > { %v895_v43 = vpop.f32.mrb[6].mxu0  ;;  %v578_v46 = vrot.slane %v560_v42, 2 }
 0x11c   : > { %v563_v44 = vpop.f32.mrb[7].mxu0 }
 0x11d   : > { %v579_v47 = vrot.slane %v563_v44, 2 }
 0x11f   : > { %v580_v49 = vsel %vm577_vm1, %v578_v46, %v579_v47  ;;  %v582_v50 = vsel %vm577_vm1, %v579_v47, %v581_v45 }
 0x120   : > { %v585_v51 = vadd.f32 %v580_v49, %v459_v39  ;;  %v586_v52 = vadd.f32 %v582_v50, %v460_v40 }
 0x122   : > { %v593_v53 = vadd.f32 %v792_v48, %v585_v51  ;;  %v594_v54 = vadd.f32 %v792_v48, %v586_v52 }
 0x124   : > { %v595_v55 = vadd.f32 %v594_v54, %v593_v53  ;;  %v602_v56 = vmul.f32 %v593_v53, %v593_v53  ;;  %v603_v57 = vmul.f32 %v594_v54, %v594_v54  ;;  %v616_v58 = vrot.slane %v593_v53, 7 }
 0x125   : > { %v617_v59 = vrot.slane %v594_v54, 7 }
 0x126   : > { %v596_v60 = vrot.slane %v595_v55, 4  ;;  %v604_v61 = vadd.f32 %v603_v57, %v602_v56  ;;  %v622_v62 = vsel %vm611_vm2, 0.0, %v616_v58 }
 0x127   : > { %v618_v63 = vsel %vm611_vm2, %v616_v58, %v617_v59  ;;  %v623_v0 = vsel %vm611_vm2, %v617_v59, 0.0 }
 0x128   : > { %v597_v1 = vadd.f32 %v596_v60, %v595_v55  ;;  %v605_v2 = vrot.slane %v604_v61, 4  ;;  %v800_v3 = vpack.c.bf16 %v623_v0, %v623_v0  ;;  %v804_v4 = vpack.c.bf16 %v618_v63, %v622_v62 }
 0x12a   : > { %v598_v5 = vrot.slane %v597_v1, 2  ;;  %v606_v6 = vadd.f32 %v605_v2, %v604_v61  ;;  %805 = vst [vmem:[%s204_s26] sm:$0xff] %v804_v4   ;;  %639 = vst [vmem:[%s204_s26 + $0x8] sm:$0x1] %v800_v3 }
 0x12c   : > { %v599_v7 = vadd.f32 %v598_v5, %v597_v1  ;;  %v607_v8 = vrot.slane %v606_v6, 2 }
 0x12e   : > { %v600_v9 = vrot.slane %v599_v7, 1  ;;  %v608_v10 = vadd.f32 %v607_v8, %v606_v6 }
 0x130   : > { %v609_v11 = vrot.slane %v608_v10, 1  ;;  %v601_v12 = vadd.f32 %v600_v9, %v599_v7 }
 0x132   : > { %v610_v13 = vadd.f32 %v609_v11, %v608_v10 }
 0x134   : > { %v612_v14 = vsel %vm611_vm2, %v601_v12, %v610_v13 }
 0x135   : > { %613 = vst [vmem:[%s208_s29] sm:$0x3] %v612_v14 }
 0x136 PF: > { %s15_s15 = sadd.s32 1, %s937_s15  }
 0x137   : > { %p12_p4 = scmp.ge.s32.totalorder %s15_s15, 4  }
 0x139   :  { %14 = sbr.rel (!%p12_p4) target bundleno = 1 (0x1), region = 76 }

// kernel: resnet_block_forward.5
= control target key start
LH: loop header
LB: loop body
LE: loop exit
PB: predicated region body
PF: predicated region fallthrough
CT: control target
= control target key end

     0   :  { %s433_s20 = smov 0   ;;  %s463_s0 = inlined_call_operand.vmem [shape: bf16[2,18,128], index: 0, kind: input, shape index: {}]   ;;  %s464_s1 = inlined_call_operand.vmem [shape: bf16[2,18,128], index: 1, kind: input, shape index: {}]   ;;  %s465_s2 = inlined_call_operand.vmem [shape: f32[1,128], index: 2, kind: input, shape index: {}]   ;;  %s466_s3 = inlined_call_operand.vmem [shape: f32[1,128], index: 3, kind: input, shape index: {}]   ;;  %s467_s4 = inlined_call_operand.<no memory space> [shape: f32[1,1], index: 4, kind: input, shape index: {}]   ;;  %s468_s5 = inlined_call_operand.vmem [shape: f32[2,18,128], index: 5, kind: output, shape index: {}]  }
   0x1   :  { %10 = sst [smem:[#allocation2]] %s467_s4 }
   0x2 LB: > { %s362_s21 = sadd.s32 4294967295, %s398_s20   ;;  %p366_p0 = scmp.ge.s32.totalorder %s398_s20, 1  ;;  %s398_s20 = sphi %s433_s20, %s16_s20  }
   0x3   : > { %p198_p1 = scmp.lt.s32.totalorder %s398_s20, 3 }
   0x5   : > { %p199_p2 = pnand %p366_p0, %p198_p1 }
   0x6   : > { %p231_p3 = scmp.lt.s32.totalorder (!%p199_p2), %s362_s21, 1  ;;  %s246_s4 = sld [smem:[#allocation2]] (!%p199_p2)  ;;  %v370_v2 = vld [vmem:[%s465_s2] ss:$0 sm:$0xff] (!%p199_p2) }
   0x7   : > { %202 = sbr.rel (%p199_p2) target bundleno = 32 (0x20), region = 40  ;;  %v371_v6 = vld [vmem:[%s466_s3] ss:$0 sm:$0xff] (!%p199_p2) }
   0xc   : > { %v276_v12 = vstv (!%p199_p2), %s246_s4 }
   0xe   : > { %s470_s21 = smov (!%p231_p3, %s362_s21), 1 }
   0xf   : > { %s382_s22 = smul.u32 12, %s470_s21 }
  0x10   : > { %s383_s8 = smul.u32 24, %s470_s21 }
  0x11   : > { %s235_s25 = scalar_lea.vmem %s463_s0, %s382_s22  ;;  %s240_s28 = scalar_lea.vmem %s464_s1, %s382_s22 }
  0x12   : > { %v375_v0 = vld [vmem:[%s235_s25] sm:$0xff]   ;;  %v249_v1 = vld [vmem:[%s235_s25 + $0x8] sm:$0x1]  ;;  %s245_s11 = scalar_lea.vmem %s468_s5, %s383_s8 }
  0x13   : > { %v376_v3 = vunpack.c.l.bf16 %v375_v0  ;;  %v377_v4 = vunpack.c.h.bf16 %v375_v0  ;;  %v252_v5 = vunpack.c.l.bf16 %v249_v1  ;;  %v379_v8 = vld [vmem:[%s240_s28] sm:$0xff]   ;;  %v285_v11 = vld [vmem:[%s240_s28 + $0x8] sm:$0x1] }
  0x14   : > { %v380_v16 = vunpack.c.l.bf16 %v379_v8  ;;  %v381_v17 = vunpack.c.h.bf16 %v379_v8  ;;  %v288_v18 = vunpack.c.l.bf16 %v285_v11 }
  0x15   : > { %v260_v7 = vmul.f32 %v376_v3, %v370_v2  ;;  %v261_v9 = vmul.f32 %v377_v4, %v370_v2  ;;  %v262_v10 = vmul.f32 %v370_v2, %v252_v5 }
  0x17   : > { %v270_v13 = vadd.f32 %v371_v6, %v260_v7  ;;  %v271_v14 = vadd.f32 %v371_v6, %v261_v9  ;;  %v272_v15 = vadd.f32 %v371_v6, %v262_v10 }
  0x19   : > { %vm273_vm0 = vcmp.gt.f32.partialorder %v270_v13, 0.0  ;;  %v277_v19 = vmul.f32 %v276_v12, %v270_v13  ;;  %vm274_vm1 = vcmp.gt.f32.partialorder %v271_v14, 0.0  ;;  %v278_v20 = vmul.f32 %v276_v12, %v271_v14 }
  0x1a   : > { %vm275_vm2 = vcmp.gt.f32.partialorder %v272_v15, 0.0  ;;  %v279_v21 = vmul.f32 %v276_v12, %v272_v15 }
  0x1b   : > { %v280_v22 = vsel %vm273_vm0, %v270_v13, %v277_v19  ;;  %v281_v23 = vsel %vm274_vm1, %v271_v14, %v278_v20 }
  0x1c   : > { %v289_v24 = vadd.f32 %v380_v16, %v280_v22  ;;  %v290_v25 = vadd.f32 %v381_v17, %v281_v23  ;;  %v282_v26 = vsel %vm275_vm2, %v272_v15, %v279_v21 }
  0x1d   : > { %v291_v27 = vadd.f32 %v288_v18, %v282_v26 }
  0x1e   : > { %292 = vst [vmem:[%s245_s11] sm:$0xff] %v289_v24  ;;  %293 = vst [vmem:[%s245_s11 + $0x8] sm:$0xff] %v290_v25 }
  0x1f   : > { %294 = vst [vmem:[%s245_s11 + $0x10] sm:$0x3] %v291_v27 }
  0x20 PF: > { %s16_s20 = sadd.s32 1, %s398_s20  }
  0x21   : > { %p13_p4 = scmp.ge.s32.totalorder %s16_s20, 4  }
  0x23   :  { %15 = sbr.rel (!%p13_p4) target bundleno = 2 (0x2), region = 73 }

// kernel: resnet_block_forward.4
= control target key start
LH: loop header
LB: loop body
LE: loop exit
PB: predicated region body
PF: predicated region fallthrough
CT: control target
= control target key end

     0   :  { %s1134_s26 = smov 0   ;;  %s1268_s0 = inlined_call_operand.vmem [shape: bf16[2,18,128], index: 0, kind: input, shape index: {}]   ;;  %s1269_s1 = inlined_call_operand.vmem [shape: bf16[3,128,128], index: 1, kind: input, shape index: {}]   ;;  %s1270_s2 = inlined_call_operand.vmem [shape: f32[1,128], index: 2, kind: input, shape index: {}]   ;;  %s1271_s3 = inlined_call_operand.vmem [shape: f32[1,128], index: 3, kind: input, shape index: {}]   ;;  %s1272_s4 = inlined_call_operand.vmem [shape: f32[1,128], index: 4, kind: input, shape index: {}]   ;;  %s1273_s5 = inlined_call_operand.<no memory space> [shape: f32[1,1], index: 5, kind: input, shape index: {}]   ;;  %s1274_s6 = inlined_call_operand.vmem [shape: bf16[2,18,128], index: 6, kind: output, shape index: {0}]   ;;  %s1275_s7 = inlined_call_operand.vmem [shape: f32[2,2,128], index: 7, kind: output, shape index: {1}]  }
   0x1   :  { %13 = sst [smem:[#allocation2]] %s1273_s5 }
   0x2 LB: > { %s856_s27 = sadd.s32 4294967295, %s1088_s26   ;;  %p860_p0 = scmp.ge.s32.totalorder %s1088_s26, 1  ;;  %s1088_s26 = sphi %s1134_s26, %s19_s26  }
   0x3   : > { %p241_p1 = scmp.lt.s32.totalorder %s1088_s26, 3 }
   0x5   : > { %p242_p2 = pnand %p860_p0, %p241_p1 }
   0x6   : > { %v1058_v0 = vld [vmem:[%s1269_s1] sm:$0xff] (!%p242_p2)   ;;  %p277_p3 = scmp.lt.s32.totalorder (!%p242_p2), %s856_s27, 1  ;;  %v1060_v2 = vld [vmem:[%s1269_s1 + $0x8] sm:$0xff] (!%p242_p2)   ;;  %v1062_v4 = vld [vmem:[%s1269_s1 + $0x10] sm:$0xff] (!%p242_p2)   ;;  %v329_v10 = vlaneseq (!%p242_p2)  ;;  %s292_s8 = sld [smem:[#allocation2]] (!%p242_p2)  ;;  %vm1090_vm4 = vmmov (!%p242_p2), 1  }
   0x7   : > { %245 = sbr.rel (%p242_p2) target bundleno = 311 (0x137), region = 44  ;;  %v1059_v1 = vld [vmem:[%s1269_s1 + $0x40] sm:$0xff] (!%p242_p2)   ;;  %988 = vmatprep.subr.bf16.mxu0 (!%p242_p2), %v1058_v0  ;;  %v1061_v3 = vld [vmem:[%s1269_s1 + $0x48] sm:$0xff] (!%p242_p2)   ;;  %v1063_v5 = vld [vmem:[%s1269_s1 + $0x50] sm:$0xff] (!%p242_p2)   ;;  %vm581_vm8 = vcmask (!%p242_p2), 1046528   ;;  %vm707_vm9 = vcmask (!%p242_p2), 1045504  }
   0x8   : > { %1008 = vmatprep.subr.bf16.mxu1 (!%p242_p2), %v1059_v1  ;;  %989 = vmatpush3.bf16.msra.mxu0 (!%p242_p2), %v1058_v0  ;;  %v1064_v6 = vld [vmem:[%s1269_s1 + $0x18] sm:$0xff] (!%p242_p2)   ;;  %v1066_v8 = vld [vmem:[%s1269_s1 + $0x20] sm:$0xff] (!%p242_p2)   ;;  %v1068_v11 = vld [vmem:[%s1269_s1 + $0x28] sm:$0xff] (!%p242_p2)   ;;  %v330_v17 = vshrl.u32 (!%p242_p2), %v329_v10, 7  ;;  %vm741_vm10 = vcmask (!%p242_p2), 1040384  }
   0x9   : > { %1009 = vmatpush3.bf16.msra.mxu1 (!%p242_p2), %v1059_v1  ;;  %990 = vmatprep.subr.bf16.mxu0 (!%p242_p2), %v1060_v2  ;;  %v1065_v7 = vld [vmem:[%s1269_s1 + $0x58] sm:$0xff] (!%p242_p2)   ;;  %v1067_v9 = vld [vmem:[%s1269_s1 + $0x60] sm:$0xff] (!%p242_p2)   ;;  %v1069_v14 = vld [vmem:[%s1269_s1 + $0x68] sm:$0xff] (!%p242_p2)  }
   0xa   : > { %1010 = vmatprep.subr.bf16.mxu1 (!%p242_p2), %v1061_v3  ;;  %v864_v13 = vld [vmem:[%s1271_s3] ss:$0 sm:$0xff] (!%p242_p2)  ;;  %v1070_v23 = vld [vmem:[%s1269_s1 + $0x30] sm:$0xff] (!%p242_p2)   ;;  %vm333_vm0 = vcmp.ge.s32.totalorder (!%p242_p2), %v330_v17, 1  ;;  %v332_v30 = vadd.s32 (!%p242_p2), 16, %v330_v17  ;;  %v1072_v33 = vld [vmem:[%s1269_s1 + $0x38] sm:$0xff] (!%p242_p2)  }
   0xb   : > { %v865_v19 = vld [vmem:[%s1272_s4] ss:$0 sm:$0xff] (!%p242_p2)  ;;  %v1071_v25 = vld [vmem:[%s1269_s1 + $0x70] sm:$0xff] (!%p242_p2)   ;;  %v1073_v35 = vld [vmem:[%s1269_s1 + $0x78] sm:$0xff] (!%p242_p2)  }
   0xc   : > { %991 = vmatpush3.bf16.msra.mxu0 (!%p242_p2), %v1060_v2  ;;  %v322_v28 = vstv (!%p242_p2), %s292_s8  ;;  %vm1205_vm5 = vmpackc.low (!%p242_p2), %vm1090_vm4, %vm333_vm0  ;;  %vm338_vm6 = vcmp.le.s32.totalorder (!%p242_p2), %v332_v30, 16  ;;  %v1074_v41 = vld [vmem:[%s1269_s1 + $0x80] sm:$0xff] (!%p242_p2)   ;;  %v1075_v44 = vld [vmem:[%s1269_s1 + $0x88] sm:$0xff] (!%p242_p2)  }
   0xd   : > { %1011 = vmatpush3.bf16.msra.mxu1 (!%p242_p2), %v1061_v3  ;;  %992 = vmatprep.subr.bf16.mxu0 (!%p242_p2), %v1062_v4  ;;  %vm1216_vm7 = vmpackc.low (!%p242_p2), %vm338_vm6, %vm338_vm6  ;;  %v1076_v45 = vld [vmem:[%s1269_s1 + $0x90] sm:$0xff] (!%p242_p2)   ;;  %v1077_v46 = vld [vmem:[%s1269_s1 + $0x98] sm:$0xff] (!%p242_p2)  }
   0xe   : > { %s1281_s27 = smov (!%p277_p3, %s856_s27), 1  ;;  %1012 = vmatprep.subr.bf16.mxu1 %v1063_v5  ;;  %v1078_v47 = vld [vmem:[%s1269_s1 + $0xa0] sm:$0xff]   ;;  %v1079_v48 = vld [vmem:[%s1269_s1 + $0xa8] sm:$0xff]   ;;  %v1080_v49 = vld [vmem:[%s1269_s1 + $0xb0] sm:$0xff]  }
   0xf   : > { %s1048_s20 = smul.u32 12, %s1281_s27  ;;  %v1081_v50 = vld [vmem:[%s1269_s1 + $0xb8] sm:$0xff]   ;;  %s863_s24 = sshll.u32 %s1281_s27, 1 }
  0x10   : > { %993 = vmatpush3.bf16.msra.mxu0 %v1062_v4  ;;  %s290_s28 = scalar_lea.vmem %s1275_s7, %s863_s24 }
  0x11   : > { %1013 = vmatpush3.bf16.msra.mxu1 %v1063_v5  ;;  %994 = vmatprep.subr.bf16.mxu0 %v1064_v6  ;;  %s281_s29 = scalar_lea.vmem %s1268_s0, %s1048_s20  ;;  %s286_s23 = scalar_lea.vmem %s1274_s6, %s1048_s20 }
  0x12   : > { %1014 = vmatprep.subr.bf16.mxu1 %v1065_v7  ;;  %v950_v12 = vld [vmem:[%s281_s29] sm:$0xff]   ;;  %v295_v18 = vld [vmem:[%s281_s29 + $0x8] sm:$0x1] }
  0x13   : > { %v951_v15 = vunpack.c.l.bf16 %v950_v12  ;;  %v952_v16 = vunpack.c.h.bf16 %v950_v12  ;;  %v298_v20 = vunpack.c.l.bf16 %v295_v18 }
  0x14   : > { %995 = vmatpush3.bf16.msra.mxu0 %v1064_v6 }
  0x15   : > { %1015 = vmatpush3.bf16.msra.mxu1 %v1065_v7  ;;  %996 = vmatprep.subr.bf16.mxu0 %v1066_v8  ;;  %v306_v21 = vmul.f32 %v951_v15, %v864_v13  ;;  %v307_v22 = vmul.f32 %v952_v16, %v864_v13  ;;  %v308_v24 = vmul.f32 %v864_v13, %v298_v20 }
  0x16   : > { %1016 = vmatprep.subr.bf16.mxu1 %v1067_v9 }
  0x17   : > { %v316_v26 = vadd.f32 %v865_v19, %v306_v21  ;;  %v317_v27 = vadd.f32 %v865_v19, %v307_v22  ;;  %v318_v29 = vadd.f32 %v865_v19, %v308_v24 }
  0x18   : > { %997 = vmatpush3.bf16.msra.mxu0 %v1066_v8 }
  0x19   : > { %1017 = vmatpush3.bf16.msra.mxu1 %v1067_v9  ;;  %998 = vmatprep.subr.bf16.mxu0 %v1068_v11  ;;  %vm319_vm1 = vcmp.gt.f32.partialorder %v316_v26, 0.0  ;;  %vm320_vm2 = vcmp.gt.f32.partialorder %v317_v27, 0.0  ;;  %v323_v31 = vmul.f32 %v322_v28, %v316_v26  ;;  %v324_v32 = vmul.f32 %v322_v28, %v317_v27  ;;  %v940_v9 = vld [vmem:[%s1270_s2] ss:$0 sm:$0xff] }
  0x1a   : > { %1018 = vmatprep.subr.bf16.mxu1 %v1069_v14  ;;  %vm321_vm3 = vcmp.gt.f32.partialorder %v318_v29, 0.0  ;;  %v325_v34 = vmul.f32 %v322_v28, %v318_v29 }
  0x1b   : > { %v326_v36 = vsel %vm319_vm1, %v316_v26, %v323_v31  ;;  %v327_v37 = vsel %vm320_vm2, %v317_v27, %v324_v32 }
  0x1c   : > { %999 = vmatpush3.bf16.msra.mxu0 %v1068_v11  ;;  %v875_v39 = vpack.c.bf16 %v327_v37, %v326_v36  ;;  %v328_v40 = vsel %vm321_vm3, %v318_v29, %v325_v34 }
  0x1d   : > { %1019 = vmatpush3.bf16.msra.mxu1 %v1069_v14  ;;  %1000 = vmatprep.subr.bf16.mxu0 %v1070_v23  ;;  %v878_v42 = vpack.c.bf16 %v328_v40, %v328_v40 }
  0x1e   : > { %1020 = vmatprep.subr.bf16.mxu1 %v1071_v25  ;;  %1004 = vmatprep.mubr.msk.bf16.mxu0 %vm1205_vm5, %v875_v39 }
  0x1f   : > { %1024 = vmatprep.mubr.msk.bf16.mxu1 %vm1205_vm5, %v875_v39 }
  0x20   : > { %1001 = vmatpush3.bf16.msra.mxu0 %v1070_v23 }
  0x21   : > { %1021 = vmatpush3.bf16.msra.mxu1 %v1071_v25  ;;  %1002 = vmatprep.subr.bf16.mxu0 %v1072_v33 }
  0x22   : > { %1022 = vmatprep.subr.bf16.mxu1 %v1073_v35 }
  0x24   : > { %1003 = vmatpush3.bf16.msra.mxu0 %v1072_v33 }
  0x25   : > { %1023 = vmatpush3.bf16.msra.mxu1 %v1073_v35  ;;  %1028 = vmatprep.subr.bf16.mxu0 %v1074_v41 }
  0x27   : > { %1005 = vmatmul.mubr.msk.bf16.vlgmr.msra.gmra.mrb[0].mxu0 %vm1216_vm7, %v878_v42 }
  0x28   : > { %1025 = vmatmul.mubr.msk.bf16.vlgmr.msra.gmra.mrb[0].mxu1 %vm1216_vm7, %v878_v42  ;;  %1029 = vmatpush3.bf16.msra.mxu0 %v1074_v41 }
  0x29   : > { %1030 = vmatprep.subr.bf16.mxu0 %v1075_v44  ;;  %1044 = vmatprep.mubr.msk.bf16.mxu0 %vm1205_vm5, %v875_v39 }
  0x2c   : > { %1031 = vmatpush3.bf16.msra.mxu0 %v1075_v44 }
  0x2d   : > { %1032 = vmatprep.subr.bf16.mxu0 %v1076_v45 }
  0x30   : > { %1033 = vmatpush3.bf16.msra.mxu0 %v1076_v45 }
  0x31   : > { %1034 = vmatprep.subr.bf16.mxu0 %v1077_v46 }
  0x34   : > { %1035 = vmatpush3.bf16.msra.mxu0 %v1077_v46 }
  0x35   : > { %1036 = vmatprep.subr.bf16.mxu0 %v1078_v47 }
  0x38   : > { %1037 = vmatpush3.bf16.msra.mxu0 %v1078_v47 }
  0x39   : > { %1038 = vmatprep.subr.bf16.mxu0 %v1079_v48 }
  0x3c   : > { %1039 = vmatpush3.bf16.msra.mxu0 %v1079_v48 }
  0x3d   : > { %1040 = vmatprep.subr.bf16.mxu0 %v1080_v49 }
  0x40   : > { %1041 = vmatpush3.bf16.msra.mxu0 %v1080_v49 }
  0x41   : > { %1042 = vmatprep.subr.bf16.mxu0 %v1081_v50 }
  0x44   : > { %1043 = vmatpush3.bf16.msra.mxu0 %v1081_v50 }
  0x47   : > { %1045 = vmatmul.mubr.msk.bf16.vlgmr.msra.gmra.mrb[4].mxu0 %vm1216_vm7, %v878_v42 }
  0xfa   : > { %v1006_v51 = vpop.f32.mrb[0].mxu0 }
  0xfb   : > { %v1026_v52 = vpop.f32.mrb[0].mxu1  ;;  %v452_v53 = vpop.f32.mrb[1].mxu0 }
  0xfc   : > { %v564_v54 = vpop.f32.mrb[1].mxu1  ;;  %v1007_v55 = vpop.f32.mrb[2].mxu0  ;;  %v585_v56 = vrot.slane %v1026_v52, 1 }
  0xfd   : > { %v582_v57 = vrot.slane %v564_v54, 1  ;;  %v1027_v58 = vpop.f32.mrb[2].mxu1  ;;  %v455_v59 = vpop.f32.mrb[3].mxu0 }
  0xfe   : > { %v567_v60 = vpop.f32.mrb[3].mxu1 }
  0xff   : > { %v583_v61 = vrot.slane %v567_v60, 1 }
 0x101   : > { %v584_v62 = vsel %vm581_vm8, %v582_v57, %v583_v61  ;;  %v586_v63 = vsel %vm581_vm8, %v583_v61, %v585_v56 }
 0x102   : > { %v589_v0 = vadd.f32 %v584_v62, %v452_v53  ;;  %v590_v1 = vadd.f32 %v586_v63, %v455_v59 }
 0x11a   : > { %v1046_v2 = vpop.f32.mrb[4].mxu0 }
 0x11b   : > { %v690_v3 = vpop.f32.mrb[5].mxu0  ;;  %v711_v6 = vrot.slane %v1046_v2, 2 }
 0x11c   : > { %v1047_v4 = vpop.f32.mrb[6].mxu0  ;;  %v708_v7 = vrot.slane %v690_v3, 2 }
 0x11d   : > { %v693_v5 = vpop.f32.mrb[7].mxu0 }
 0x11e   : > { %v709_v8 = vrot.slane %v693_v5, 2 }
 0x120   : > { %v710_v10 = vsel %vm707_vm9, %v708_v7, %v709_v8  ;;  %v712_v11 = vsel %vm707_vm9, %v709_v8, %v711_v6 }
 0x121   : > { %v715_v12 = vadd.f32 %v710_v10, %v589_v0  ;;  %v716_v13 = vadd.f32 %v712_v11, %v590_v1 }
 0x123   : > { %v723_v14 = vadd.f32 %v940_v9, %v715_v12  ;;  %v724_v15 = vadd.f32 %v940_v9, %v716_v13 }
 0x125   : > { %v725_v16 = vadd.f32 %v724_v15, %v723_v14  ;;  %v732_v17 = vmul.f32 %v723_v14, %v723_v14  ;;  %v733_v18 = vmul.f32 %v724_v15, %v724_v15  ;;  %v746_v19 = vrot.slane %v723_v14, 7 }
 0x126   : > { %v747_v20 = vrot.slane %v724_v15, 7 }
 0x127   : > { %v726_v21 = vrot.slane %v725_v16, 4  ;;  %v734_v22 = vadd.f32 %v733_v18, %v732_v17  ;;  %v752_v23 = vsel %vm741_vm10, 0.0, %v746_v19 }
 0x128   : > { %v748_v24 = vsel %vm741_vm10, %v746_v19, %v747_v20  ;;  %v753_v25 = vsel %vm741_vm10, %v747_v20, 0.0 }
 0x129   : > { %v727_v26 = vadd.f32 %v726_v21, %v725_v16  ;;  %v735_v27 = vrot.slane %v734_v22, 4  ;;  %v948_v28 = vpack.c.bf16 %v753_v25, %v753_v25  ;;  %v956_v29 = vpack.c.bf16 %v748_v24, %v752_v23 }
 0x12b   : > { %v728_v30 = vrot.slane %v727_v26, 2  ;;  %v736_v31 = vadd.f32 %v735_v27, %v734_v22  ;;  %957 = vst [vmem:[%s286_s23] sm:$0xff] %v956_v29   ;;  %769 = vst [vmem:[%s286_s23 + $0x8] sm:$0x1] %v948_v28 }
 0x12d   : > { %v729_v32 = vadd.f32 %v728_v30, %v727_v26  ;;  %v737_v33 = vrot.slane %v736_v31, 2 }
 0x12f   : > { %v730_v34 = vrot.slane %v729_v32, 1  ;;  %v738_v35 = vadd.f32 %v737_v33, %v736_v31 }
 0x131   : > { %v739_v36 = vrot.slane %v738_v35, 1  ;;  %v731_v37 = vadd.f32 %v730_v34, %v729_v32 }
 0x133   : > { %v740_v38 = vadd.f32 %v739_v36, %v738_v35 }
 0x135   : > { %v742_v39 = vsel %vm741_vm10, %v731_v37, %v740_v38 }
 0x136   : > { %743 = vst [vmem:[%s290_s28] sm:$0x3] %v742_v39 }
 0x137 PF: > { %s19_s26 = sadd.s32 1, %s1088_s26  }
 0x138   : > { %p16_p4 = scmp.ge.s32.totalorder %s19_s26, 4  }
 0x13a   :  { %18 = sbr.rel (!%p16_p4) target bundleno = 2 (0x2), region = 88 }

</bundles_post_ra>
